<compile_context>
chip_gen: v6e
topology: v6e:2x2x1
jax: 0.10.0
libtpu: 0.0.40
codegen_flags: <defaults>
</compile_context>

<pallas_src>
import jax
import jax.numpy as jnp
from jax.experimental import pallas as pl
from jax.experimental.pallas import tpu as pltpu


def bottleneck_kernel(x_ref, xt_ref, xb_ref, w1_ref, b1_ref, w2_ref, b2_ref,
                      w3_ref, b3_ref, o_ref, h1f_ref):
    GUARD = 8                              # guard rows at each end of h1f
    M = x_ref.shape[1]                     # TILE_H * W pixels in this tile
    W = xt_ref.shape[1]                    # image width (pixels per row)
    P = w1_ref.shape[1]                    # planes
    Cout = w3_ref.shape[1]                 # planes * 4 (== Cin)

    t = pl.program_id(1)
    nt = pl.num_programs(1)

    x_int = x_ref[0]                                         # (M, Cin) bf16

    # ---- conv1 (1x1, BN1 scale folded) + bias + relu, interior rows ----
    h1 = jnp.dot(x_int, w1_ref[...], preferred_element_type=jnp.float32)
    h1 = jnp.maximum(h1 + b1_ref[...], 0.0)                  # (M, P) f32
    h1f_ref[pl.ds(GUARD + W, M), :] = h1

    # ---- conv1 on the two halo rows (2/TILE_H duplicated work) ----
    def conv1_row(row_ref):
        h = jnp.dot(row_ref[0], w1_ref[...],
                    preferred_element_type=jnp.float32)
        return jnp.maximum(h + b1_ref[...], 0.0)             # (W, P) f32

    h1_top = conv1_row(xt_ref)
    h1_bot = conv1_row(xb_ref)
    zero_row = jnp.zeros((W, P), jnp.float32)

    # Reference zero-pads AFTER conv1/bn1/relu -> border halo rows must be 0.
    @pl.when(t > 0)
    def _(): h1f_ref[pl.ds(GUARD, W), :] = h1_top

    @pl.when(t == 0)
    def _(): h1f_ref[pl.ds(GUARD, W), :] = zero_row

    @pl.when(t < nt - 1)
    def _(): h1f_ref[pl.ds(GUARD + W + M, W), :] = h1_bot

    @pl.when(t == nt - 1)
    def _(): h1f_ref[pl.ds(GUARD + W + M, W), :] = zero_row

    # ---- conv2 (3x3, stride 1, pad 1) + bias + relu ----
    # 9 accumulated (M, P) @ (P, P) matmuls over sublane-shifted views of the
    # flat padded-h1 buffer (no concat im2col, no per-tap reshape copies).
    def tap_group(kw):                     # sum over kernel rows for column kw
        acc = None
        for kh in range(3):
            start = GUARD + kh * W + kw - 1
            lhs = h1f_ref[pl.ds(start, M), :].astype(jnp.bfloat16)
            d = jnp.dot(lhs, w2_ref[kh * 3 + kw],
                        preferred_element_type=jnp.float32)
            acc = d if acc is None else acc + d
        return acc                                            # (M, P) f32

    left, mid, right = tap_group(0), tap_group(1), tap_group(2)
    col = jax.lax.broadcasted_iota(jnp.int32, (M, 1), 0) % W
    h2 = (mid
          + jnp.where(col > 0, left, 0.0)          # kw=0 invalid at x == 0
          + jnp.where(col < W - 1, right, 0.0))    # kw=2 invalid at x == W-1
    h2 = jnp.maximum(h2 + b2_ref[...], 0.0)                   # (M, P) f32

    # ---- conv3 (1x1, BN3 scale folded) + bias ----
    h3 = jnp.dot(h2.astype(jnp.bfloat16), w3_ref[...],
                 preferred_element_type=jnp.float32) + b3_ref[...]

    # ---- residual add (f32) + relu, store bf16 ----
    y = jnp.maximum(h3 + x_int.astype(jnp.float32), 0.0)
    o_ref[...] = y.reshape(1, M, Cout).astype(o_ref.dtype)


def bottleneck_pallas(x_nhwc, w1, b1, w2, b2, w3, b3, *, tile_h=8,
                      vmem_limit_bytes=64 * 1024 * 1024):
    """x_nhwc: (N, H, W, Cin) bfloat16 (activations are bf16 end-to-end).
    w1: (Cin, P) bf16 (BN1 scale folded)        b1: (1, P) f32
    w2: (9, P, P) bf16, tap index = kh*3+kw     b2: (1, P) f32
    w3: (P, Cout) bf16 (BN3 scale folded)       b3: (1, Cout) f32
    For real 56x56 stages raise tile_h (28-56 on v5e/v6e, smaller on v7x's
    64 MiB VMEM) and re-derive vmem_limit_bytes."""
    N, H, W, Cin = x_nhwc.shape
    P = w1.shape[1]
    Cout = w3.shape[1]
    assert Cout == Cin, "downsample=None requires inplanes == planes*4"
    assert H % tile_h == 0
    nt = H // tile_h
    M = tile_h * W

    x2 = x_nhwc.reshape(N, H * W, Cin)     # free bitcast; lane dim = channels

    out = pl.pallas_call(
        bottleneck_kernel,
        out_shape=jax.ShapeDtypeStruct((N, H * W, Cout), x_nhwc.dtype),
        grid_spec=pltpu.PrefetchScalarGridSpec(
            num_scalar_prefetch=0,
            grid=(N, nt),
            in_specs=[
                # interior rows of this tile (non-overlapping -> read once)
                pl.BlockSpec((1, M, Cin), lambda n, t: (n, t, 0)),
                # 1-row halos; index clamped at the image border (border
                # tiles replace the halo h1 with zeros in-kernel)
                pl.BlockSpec((1, W, Cin),
                             lambda n, t: (n, jnp.maximum(t * tile_h - 1, 0), 0)),
                pl.BlockSpec((1, W, Cin),
                             lambda n, t: (n, jnp.minimum((t + 1) * tile_h, H - 1), 0)),
                # weights / biases: constant index_map -> not re-DMA'd per
                # grid step by the pipeline.
                pl.BlockSpec((Cin, P), lambda n, t: (0, 0)),       # w1
                pl.BlockSpec((1, P), lambda n, t: (0, 0)),         # b1
                pl.BlockSpec((9, P, P), lambda n, t: (0, 0, 0)),   # w2 taps
                pl.BlockSpec((1, P), lambda n, t: (0, 0)),         # b2
                pl.BlockSpec((P, Cout), lambda n, t: (0, 0)),      # w3
                pl.BlockSpec((1, Cout), lambda n, t: (0, 0)),      # b3
            ],
            out_specs=pl.BlockSpec((1, M, Cout), lambda n, t: (n, t, 0)),
            scratch_shapes=[
                # flat padded h1: 8 guard rows | padded rows 0..tile_h+1
                # (each W pixels wide) | 8 guard rows
                pltpu.VMEM(((tile_h + 2) * W + 16, P), jnp.float32)],
        ),
        compiler_params=pltpu.CompilerParams(
            dimension_semantics=("parallel", "parallel"),
            vmem_limit_bytes=vmem_limit_bytes),
    )(x2, x2, x2, w1, b1, w2, b2, w3, b3)

    return out.reshape(N, H, W, Cout)


# ------------------------- parameter preparation -------------------------
def _fold_bn(gamma, beta, mean, var, eps=1e-5):
    scale = gamma / jnp.sqrt(var + eps)
    bias = beta - mean * scale
    return scale, bias


def prepare_params(c1, c2, c3, bn1, bn2, bn3):
    """Fold BN scales into bf16 matmul weights; per-channel biases stay f32.
    NOTE: folding before the bf16 cast amplifies quantization error when
    gamma/sqrt(var+eps) is large; monitor with real trained statistics."""
    P = c1.shape[0]
    s1, b1 = _fold_bn(*bn1)
    s2, b2 = _fold_bn(*bn2)
    s3, b3 = _fold_bn(*bn3)
    w1 = (jnp.transpose(c1[:, :, 0, 0], (1, 0)) * s1[None, :]).astype(jnp.bfloat16)
    w2 = (jnp.transpose(c2, (2, 3, 1, 0)) * s2[None, None, None, :]
          ).reshape(9, P, P).astype(jnp.bfloat16)       # tap index = kh*3 + kw
    w3 = (jnp.transpose(c3[:, :, 0, 0], (1, 0)) * s3[None, :]).astype(jnp.bfloat16)
    return (w1, b1.reshape(1, -1), w2, b2.reshape(1, -1), w3, b3.reshape(1, -1))


# ------------------------- reference (pure JAX, f32) -------------------------
def _conv_nhwc(x, w_oihw, stride, pad):
    w_hwio = jnp.transpose(w_oihw, (2, 3, 1, 0))
    return jax.lax.conv_general_dilated(
        x, w_hwio, (stride, stride), [(pad, pad), (pad, pad)],
        dimension_numbers=("NHWC", "HWIO", "NHWC"))


def _bn(x, gamma, beta, mean, var, eps=1e-5):
    return (x - mean) / jnp.sqrt(var + eps) * gamma + beta


def bottleneck_ref(x, p):
    out = jax.nn.relu(_bn(_conv_nhwc(x, p["c1"], 1, 0), *p["bn1"]))
    out = jax.nn.relu(_bn(_conv_nhwc(out, p["c2"], 1, 1), *p["bn2"]))
    out = _bn(_conv_nhwc(out, p["c3"], 1, 0), *p["bn3"])
    return jax.nn.relu(out + x)


if __name__ == "__main__":
    # Small shapes consistent with the module: inplanes = planes * expansion.
    # NOTE: channel counts this small leave most MXU lanes idle; use
    # planes >= 64 (channel dims multiples of 128) and larger tile_h for
    # meaningful perf numbers.
    N, H, W = 2, 16, 16
    planes = 4
    inplanes = planes * 4       # 16 -> residual add valid (downsample=None)

    key = jax.random.PRNGKey(0)
    keys = jax.random.split(key, 8)

    # Conv weights, PyTorch OIHW convention, deterministic init.
    c1 = jax.random.normal(keys[0], (planes, inplanes, 1, 1), jnp.float32) * 0.1
    c2 = jax.random.normal(keys[1], (planes, planes, 3, 3), jnp.float32) * 0.1
    c3 = jax.random.normal(keys[2], (planes * 4, planes, 1, 1), jnp.float32) * 0.1

    def bn_params(k, c):
        k1, k2, k3, k4 = jax.random.split(k, 4)
        gamma = jax.random.uniform(k1, (c,), jnp.float32, 0.5, 1.5)
        beta = jax.random.normal(k2, (c,), jnp.float32) * 0.1
        mean = jax.random.normal(k3, (c,), jnp.float32) * 0.1
        var = jax.random.uniform(k4, (c,), jnp.float32, 0.5, 1.5)
        return gamma, beta, mean, var

    bn1 = bn_params(keys[3], planes)
    bn2 = bn_params(keys[4], planes)
    bn3 = bn_params(keys[5], planes * 4)

    # Input built directly in NHWC; activations handed to the kernel in bf16.
    x = jax.random.normal(keys[6], (N, H, W, inplanes), jnp.float32)

    params = prepare_params(c1, c2, c3, bn1, bn2, bn3)
    out = bottleneck_pallas(x.astype(jnp.bfloat16), *params, tile_h=8)
    out = jax.block_until_ready(out)

    ref = bottleneck_ref(x, {"c1": c1, "c2": c2, "c3": c3,
                             "bn1": bn1, "bn2": bn2, "bn3": bn3})
    ref = jax.block_until_ready(ref)

    assert out.shape == (N, H, W, planes * 4)
    assert out.dtype == jnp.bfloat16
    # bf16 activations + bf16 MXU operands (f32 accumulation) vs f32 ref.
    outf = out.astype(jnp.float32)
    err = jnp.max(jnp.abs(outf - ref))
    assert jnp.allclose(outf, ref, rtol=3e-2, atol=3e-2), f"max abs err {err}"

    print("KERNEL_OK")
</pallas_src>

<mosaic_0001>
module attributes {stable_mosaic.version = 11 : i64} {
  func.func @bottleneck_kernel(%arg0: i32, %arg1: i32, %arg2: memref<1x128x16xbf16, #tpu.memory_space<vmem>>, %arg3: memref<1x16x16xbf16, #tpu.memory_space<vmem>>, %arg4: memref<1x16x16xbf16, #tpu.memory_space<vmem>>, %arg5: memref<16x4xbf16, #tpu.memory_space<vmem>>, %arg6: memref<1x4xf32, #tpu.memory_space<vmem>>, %arg7: memref<9x4x4xbf16, #tpu.memory_space<vmem>>, %arg8: memref<1x4xf32, #tpu.memory_space<vmem>>, %arg9: memref<4x16xbf16, #tpu.memory_space<vmem>>, %arg10: memref<1x16xf32, #tpu.memory_space<vmem>>, %arg11: memref<1x128x16xbf16, #tpu.memory_space<vmem>>, %arg12: memref<176x4xf32, #tpu.memory_space<vmem>>) attributes {dimension_semantics = [#tpu.dimension_semantics<parallel>, #tpu.dimension_semantics<parallel>], iteration_bounds = array<i64: 2, 2>, scalar_prefetch = 0 : i64, scratch_operands = 1 : i64, tpu.core_type = #tpu.core_type<tc>, window_params = [{transform_indices = @transform_0, window_bounds = array<i64: 1, 128, 16>}, {transform_indices = @transform_1, window_bounds = array<i64: 1, 16, 16>}, {transform_indices = @transform_2, window_bounds = array<i64: 1, 16, 16>}, {pipeline_mode = #tpu.pipeline_mode<synchronous>, transform_indices = @transform_3, window_bounds = array<i64: 16, 4>}, {pipeline_mode = #tpu.pipeline_mode<synchronous>, transform_indices = @transform_4, window_bounds = array<i64: 1, 4>}, {pipeline_mode = #tpu.pipeline_mode<synchronous>, transform_indices = @transform_5, window_bounds = array<i64: 9, 4, 4>}, {pipeline_mode = #tpu.pipeline_mode<synchronous>, transform_indices = @transform_6, window_bounds = array<i64: 1, 4>}, {pipeline_mode = #tpu.pipeline_mode<synchronous>, transform_indices = @transform_7, window_bounds = array<i64: 4, 16>}, {pipeline_mode = #tpu.pipeline_mode<synchronous>, transform_indices = @transform_8, window_bounds = array<i64: 1, 16>}, {transform_indices = @transform_9, window_bounds = array<i64: 1, 128, 16>}]} {
    %c0 = arith.constant 0 : index
    %c0_0 = arith.constant 0 : index
    %c0_1 = arith.constant 0 : index
    %0 = vector.load %arg2[%c0, %c0_0, %c0_1] : memref<1x128x16xbf16, #tpu.memory_space<vmem>>, vector<1x128x16xbf16>
    %1 = vector.shape_cast %0 : vector<1x128x16xbf16> to vector<128x16xbf16>
    %c0_2 = arith.constant 0 : index
    %c0_3 = arith.constant 0 : index
    %2 = vector.load %arg5[%c0_2, %c0_3] : memref<16x4xbf16, #tpu.memory_space<vmem>>, vector<16x4xbf16>
    %cst = arith.constant dense<0.000000e+00> : vector<128x4xf32>
    %3 = tpu.matmul %1, %2, %cst {dimension_numbers = #tpu.dot_dimension_numbers<[1], [0], [0], [1], [0, 0, 1, 1], [], []>} : vector<128x16xbf16>, vector<16x4xbf16>, vector<128x4xf32> -> vector<128x4xf32>
    %c0_4 = arith.constant 0 : index
    %c0_5 = arith.constant 0 : index
    %4 = vector.load %arg6[%c0_4, %c0_5] : memref<1x4xf32, #tpu.memory_space<vmem>>, vector<1x4xf32>
    %5 = vector.broadcast %4 : vector<1x4xf32> to vector<128x4xf32>
    %6 = arith.addf %3, %5 : vector<128x4xf32>
    %cst_6 = arith.constant 0.000000e+00 : f32
    %7 = vector.broadcast %cst_6 : f32 to vector<128x4xf32>
    %8 = arith.maximumf %6, %7 : vector<128x4xf32>
    %c24 = arith.constant 24 : index
    %c0_7 = arith.constant 0 : index
    %9 = vector.load %arg12[%c24, %c0_7] : memref<176x4xf32, #tpu.memory_space<vmem>>, vector<128x4xf32>
    tpu.vector_store %arg12[%c24, %c0_7], %8 {strides = array<i32>} : memref<176x4xf32, #tpu.memory_space<vmem>>, vector<128x4xf32>,
    %c0_8 = arith.constant 0 : index
    %c0_9 = arith.constant 0 : index
    %c0_10 = arith.constant 0 : index
    %10 = vector.load %arg3[%c0_8, %c0_9, %c0_10] : memref<1x16x16xbf16, #tpu.memory_space<vmem>>, vector<1x16x16xbf16>
    %11 = vector.shape_cast %10 : vector<1x16x16xbf16> to vector<16x16xbf16>
    %c0_11 = arith.constant 0 : index
    %c0_12 = arith.constant 0 : index
    %12 = vector.load %arg5[%c0_11, %c0_12] : memref<16x4xbf16, #tpu.memory_space<vmem>>, vector<16x4xbf16>
    %cst_13 = arith.constant dense<0.000000e+00> : vector<16x4xf32>
    %13 = tpu.matmul %11, %12, %cst_13 {dimension_numbers = #tpu.dot_dimension_numbers<[1], [0], [0], [1], [0, 0, 1, 1], [], []>} : vector<16x16xbf16>, vector<16x4xbf16>, vector<16x4xf32> -> vector<16x4xf32>
    %c0_14 = arith.constant 0 : index
    %c0_15 = arith.constant 0 : index
    %14 = vector.load %arg6[%c0_14, %c0_15] : memref<1x4xf32, #tpu.memory_space<vmem>>, vector<1x4xf32>
    %15 = vector.broadcast %14 : vector<1x4xf32> to vector<16x4xf32>
    %16 = arith.addf %13, %15 : vector<16x4xf32>
    %cst_16 = arith.constant 0.000000e+00 : f32
    %17 = vector.broadcast %cst_16 : f32 to vector<16x4xf32>
    %18 = arith.maximumf %16, %17 : vector<16x4xf32>
    %c0_17 = arith.constant 0 : index
    %c0_18 = arith.constant 0 : index
    %c0_19 = arith.constant 0 : index
    %19 = vector.load %arg4[%c0_17, %c0_18, %c0_19] : memref<1x16x16xbf16, #tpu.memory_space<vmem>>, vector<1x16x16xbf16>
    %20 = vector.shape_cast %19 : vector<1x16x16xbf16> to vector<16x16xbf16>
    %c0_20 = arith.constant 0 : index
    %c0_21 = arith.constant 0 : index
    %21 = vector.load %arg5[%c0_20, %c0_21] : memref<16x4xbf16, #tpu.memory_space<vmem>>, vector<16x4xbf16>
    %cst_22 = arith.constant dense<0.000000e+00> : vector<16x4xf32>
    %22 = tpu.matmul %20, %21, %cst_22 {dimension_numbers = #tpu.dot_dimension_numbers<[1], [0], [0], [1], [0, 0, 1, 1], [], []>} : vector<16x16xbf16>, vector<16x4xbf16>, vector<16x4xf32> -> vector<16x4xf32>
    %c0_23 = arith.constant 0 : index
    %c0_24 = arith.constant 0 : index
    %23 = vector.load %arg6[%c0_23, %c0_24] : memref<1x4xf32, #tpu.memory_space<vmem>>, vector<1x4xf32>
    %24 = vector.broadcast %23 : vector<1x4xf32> to vector<16x4xf32>
    %25 = arith.addf %22, %24 : vector<16x4xf32>
    %cst_25 = arith.constant 0.000000e+00 : f32
    %26 = vector.broadcast %cst_25 : f32 to vector<16x4xf32>
    %27 = arith.maximumf %25, %26 : vector<16x4xf32>
    %cst_26 = arith.constant 0.000000e+00 : f32
    %28 = vector.broadcast %cst_26 : f32 to vector<16x4xf32>
    %c0_i32 = arith.constant 0 : i32
    %29 = arith.cmpi sgt, %arg1, %c0_i32 : i32
    %30 = arith.extui %29 : i1 to i32
    %c0_i32_27 = arith.constant 0 : i32
    %31 = arith.cmpi ne, %30, %c0_i32_27 : i32
    scf.if %31 {
      %c8_93 = arith.constant 8 : index
      %c0_94 = arith.constant 0 : index
      %141 = vector.load %arg12[%c8_93, %c0_94] : memref<176x4xf32, #tpu.memory_space<vmem>>, vector<16x4xf32>
      tpu.vector_store %arg12[%c8_93, %c0_94], %18 {strides = array<i32>} : memref<176x4xf32, #tpu.memory_space<vmem>>, vector<16x4xf32>,
    } else {
    }
    %c0_i32_28 = arith.constant 0 : i32
    %32 = arith.cmpi eq, %arg1, %c0_i32_28 : i32
    %33 = arith.extui %32 : i1 to i32
    %c0_i32_29 = arith.constant 0 : i32
    %34 = arith.cmpi ne, %33, %c0_i32_29 : i32
    scf.if %34 {
      %c8_93 = arith.constant 8 : index
      %c0_94 = arith.constant 0 : index
      %141 = vector.load %arg12[%c8_93, %c0_94] : memref<176x4xf32, #tpu.memory_space<vmem>>, vector<16x4xf32>
      tpu.vector_store %arg12[%c8_93, %c0_94], %28 {strides = array<i32>} : memref<176x4xf32, #tpu.memory_space<vmem>>, vector<16x4xf32>,
    } else {
    }
    %c1_i32 = arith.constant 1 : i32
    %35 = arith.cmpi slt, %arg1, %c1_i32 : i32
    %36 = arith.extui %35 : i1 to i32
    %c0_i32_30 = arith.constant 0 : i32
    %37 = arith.cmpi ne, %36, %c0_i32_30 : i32
    scf.if %37 {
      %c152 = arith.constant 152 : index
      %c0_93 = arith.constant 0 : index
      %141 = vector.load %arg12[%c152, %c0_93] : memref<176x4xf32, #tpu.memory_space<vmem>>, vector<16x4xf32>
      tpu.vector_store %arg12[%c152, %c0_93], %27 {strides = array<i32>} : memref<176x4xf32, #tpu.memory_space<vmem>>, vector<16x4xf32>,
    } else {
    }
    %c1_i32_31 = arith.constant 1 : i32
    %38 = arith.cmpi eq, %arg1, %c1_i32_31 : i32
    %39 = arith.extui %38 : i1 to i32
    %c0_i32_32 = arith.constant 0 : i32
    %40 = arith.cmpi ne, %39, %c0_i32_32 : i32
    scf.if %40 {
      %c152 = arith.constant 152 : index
      %c0_93 = arith.constant 0 : index
      %141 = vector.load %arg12[%c152, %c0_93] : memref<176x4xf32, #tpu.memory_space<vmem>>, vector<16x4xf32>
      tpu.vector_store %arg12[%c152, %c0_93], %28 {strides = array<i32>} : memref<176x4xf32, #tpu.memory_space<vmem>>, vector<16x4xf32>,
    } else {
    }
    %c7 = arith.constant 7 : index
    %c0_33 = arith.constant 0 : index
    %41 = vector.load %arg12[%c7, %c0_33] : memref<176x4xf32, #tpu.memory_space<vmem>>, vector<128x4xf32>
    %42 = arith.truncf %41 : vector<128x4xf32> to vector<128x4xbf16>
    %c0_34 = arith.constant 0 : index
    %c0_35 = arith.constant 0 : index
    %c0_36 = arith.constant 0 : index
    %43 = vector.load %arg7[%c0_34, %c0_35, %c0_36] : memref<9x4x4xbf16, #tpu.memory_space<vmem>>, vector<1x4x4xbf16>
    %44 = vector.shape_cast %43 : vector<1x4x4xbf16> to vector<4x4xbf16>
    %cst_37 = arith.constant dense<0.000000e+00> : vector<128x4xf32>
    %45 = tpu.matmul %42, %44, %cst_37 {dimension_numbers = #tpu.dot_dimension_numbers<[1], [0], [0], [1], [0, 0, 1, 1], [], []>} : vector<128x4xbf16>, vector<4x4xbf16>, vector<128x4xf32> -> vector<128x4xf32>
    %c23 = arith.constant 23 : index
    %c0_38 = arith.constant 0 : index
    %46 = vector.load %arg12[%c23, %c0_38] : memref<176x4xf32, #tpu.memory_space<vmem>>, vector<128x4xf32>
    %47 = arith.truncf %46 : vector<128x4xf32> to vector<128x4xbf16>
    %c3 = arith.constant 3 : index
    %c0_39 = arith.constant 0 : index
    %c0_40 = arith.constant 0 : index
    %48 = vector.load %arg7[%c3, %c0_39, %c0_40] : memref<9x4x4xbf16, #tpu.memory_space<vmem>>, vector<1x4x4xbf16>
    %49 = vector.shape_cast %48 : vector<1x4x4xbf16> to vector<4x4xbf16>
    %cst_41 = arith.constant dense<0.000000e+00> : vector<128x4xf32>
    %50 = tpu.matmul %47, %49, %cst_41 {dimension_numbers = #tpu.dot_dimension_numbers<[1], [0], [0], [1], [0, 0, 1, 1], [], []>} : vector<128x4xbf16>, vector<4x4xbf16>, vector<128x4xf32> -> vector<128x4xf32>
    %51 = arith.addf %45, %50 : vector<128x4xf32>
    %c39 = arith.constant 39 : index
    %c0_42 = arith.constant 0 : index
    %52 = vector.load %arg12[%c39, %c0_42] : memref<176x4xf32, #tpu.memory_space<vmem>>, vector<128x4xf32>
    %53 = arith.truncf %52 : vector<128x4xf32> to vector<128x4xbf16>
    %c6 = arith.constant 6 : index
    %c0_43 = arith.constant 0 : index
    %c0_44 = arith.constant 0 : index
    %54 = vector.load %arg7[%c6, %c0_43, %c0_44] : memref<9x4x4xbf16, #tpu.memory_space<vmem>>, vector<1x4x4xbf16>
    %55 = vector.shape_cast %54 : vector<1x4x4xbf16> to vector<4x4xbf16>
    %cst_45 = arith.constant dense<0.000000e+00> : vector<128x4xf32>
    %56 = tpu.matmul %53, %55, %cst_45 {dimension_numbers = #tpu.dot_dimension_numbers<[1], [0], [0], [1], [0, 0, 1, 1], [], []>} : vector<128x4xbf16>, vector<4x4xbf16>, vector<128x4xf32> -> vector<128x4xf32>
    %57 = arith.addf %51, %56 : vector<128x4xf32>
    %c8 = arith.constant 8 : index
    %c0_46 = arith.constant 0 : index
    %58 = vector.load %arg12[%c8, %c0_46] : memref<176x4xf32, #tpu.memory_space<vmem>>, vector<128x4xf32>
    %59 = arith.truncf %58 : vector<128x4xf32> to vector<128x4xbf16>
    %c1 = arith.constant 1 : index
    %c0_47 = arith.constant 0 : index
    %c0_48 = arith.constant 0 : index
    %60 = vector.load %arg7[%c1, %c0_47, %c0_48] : memref<9x4x4xbf16, #tpu.memory_space<vmem>>, vector<1x4x4xbf16>
    %61 = vector.shape_cast %60 : vector<1x4x4xbf16> to vector<4x4xbf16>
    %cst_49 = arith.constant dense<0.000000e+00> : vector<128x4xf32>
    %62 = tpu.matmul %59, %61, %cst_49 {dimension_numbers = #tpu.dot_dimension_numbers<[1], [0], [0], [1], [0, 0, 1, 1], [], []>} : vector<128x4xbf16>, vector<4x4xbf16>, vector<128x4xf32> -> vector<128x4xf32>
    %c24_50 = arith.constant 24 : index
    %c0_51 = arith.constant 0 : index
    %63 = vector.load %arg12[%c24_50, %c0_51] : memref<176x4xf32, #tpu.memory_space<vmem>>, vector<128x4xf32>
    %64 = arith.truncf %63 : vector<128x4xf32> to vector<128x4xbf16>
    %c4 = arith.constant 4 : index
    %c0_52 = arith.constant 0 : index
    %c0_53 = arith.constant 0 : index
    %65 = vector.load %arg7[%c4, %c0_52, %c0_53] : memref<9x4x4xbf16, #tpu.memory_space<vmem>>, vector<1x4x4xbf16>
    %66 = vector.shape_cast %65 : vector<1x4x4xbf16> to vector<4x4xbf16>
    %cst_54 = arith.constant dense<0.000000e+00> : vector<128x4xf32>
    %67 = tpu.matmul %64, %66, %cst_54 {dimension_numbers = #tpu.dot_dimension_numbers<[1], [0], [0], [1], [0, 0, 1, 1], [], []>} : vector<128x4xbf16>, vector<4x4xbf16>, vector<128x4xf32> -> vector<128x4xf32>
    %68 = arith.addf %62, %67 : vector<128x4xf32>
    %c40 = arith.constant 40 : index
    %c0_55 = arith.constant 0 : index
    %69 = vector.load %arg12[%c40, %c0_55] : memref<176x4xf32, #tpu.memory_space<vmem>>, vector<128x4xf32>
    %70 = arith.truncf %69 : vector<128x4xf32> to vector<128x4xbf16>
    %c7_56 = arith.constant 7 : index
    %c0_57 = arith.constant 0 : index
    %c0_58 = arith.constant 0 : index
    %71 = vector.load %arg7[%c7_56, %c0_57, %c0_58] : memref<9x4x4xbf16, #tpu.memory_space<vmem>>, vector<1x4x4xbf16>
    %72 = vector.shape_cast %71 : vector<1x4x4xbf16> to vector<4x4xbf16>
    %cst_59 = arith.constant dense<0.000000e+00> : vector<128x4xf32>
    %73 = tpu.matmul %70, %72, %cst_59 {dimension_numbers = #tpu.dot_dimension_numbers<[1], [0], [0], [1], [0, 0, 1, 1], [], []>} : vector<128x4xbf16>, vector<4x4xbf16>, vector<128x4xf32> -> vector<128x4xf32>
    %74 = arith.addf %68, %73 : vector<128x4xf32>
    %c9 = arith.constant 9 : index
    %c0_60 = arith.constant 0 : index
    %75 = vector.load %arg12[%c9, %c0_60] : memref<176x4xf32, #tpu.memory_space<vmem>>, vector<128x4xf32>
    %76 = arith.truncf %75 : vector<128x4xf32> to vector<128x4xbf16>
    %c2 = arith.constant 2 : index
    %c0_61 = arith.constant 0 : index
    %c0_62 = arith.constant 0 : index
    %77 = vector.load %arg7[%c2, %c0_61, %c0_62] : memref<9x4x4xbf16, #tpu.memory_space<vmem>>, vector<1x4x4xbf16>
    %78 = vector.shape_cast %77 : vector<1x4x4xbf16> to vector<4x4xbf16>
    %cst_63 = arith.constant dense<0.000000e+00> : vector<128x4xf32>
    %79 = tpu.matmul %76, %78, %cst_63 {dimension_numbers = #tpu.dot_dimension_numbers<[1], [0], [0], [1], [0, 0, 1, 1], [], []>} : vector<128x4xbf16>, vector<4x4xbf16>, vector<128x4xf32> -> vector<128x4xf32>
    %c25 = arith.constant 25 : index
    %c0_64 = arith.constant 0 : index
    %80 = vector.load %arg12[%c25, %c0_64] : memref<176x4xf32, #tpu.memory_space<vmem>>, vector<128x4xf32>
    %81 = arith.truncf %80 : vector<128x4xf32> to vector<128x4xbf16>
    %c5 = arith.constant 5 : index
    %c0_65 = arith.constant 0 : index
    %c0_66 = arith.constant 0 : index
    %82 = vector.load %arg7[%c5, %c0_65, %c0_66] : memref<9x4x4xbf16, #tpu.memory_space<vmem>>, vector<1x4x4xbf16>
    %83 = vector.shape_cast %82 : vector<1x4x4xbf16> to vector<4x4xbf16>
    %cst_67 = arith.constant dense<0.000000e+00> : vector<128x4xf32>
    %84 = tpu.matmul %81, %83, %cst_67 {dimension_numbers = #tpu.dot_dimension_numbers<[1], [0], [0], [1], [0, 0, 1, 1], [], []>} : vector<128x4xbf16>, vector<4x4xbf16>, vector<128x4xf32> -> vector<128x4xf32>
    %85 = arith.addf %79, %84 : vector<128x4xf32>
    %c41 = arith.constant 41 : index
    %c0_68 = arith.constant 0 : index
    %86 = vector.load %arg12[%c41, %c0_68] : memref<176x4xf32, #tpu.memory_space<vmem>>, vector<128x4xf32>
    %87 = arith.truncf %86 : vector<128x4xf32> to vector<128x4xbf16>
    %c8_69 = arith.constant 8 : index
    %c0_70 = arith.constant 0 : index
    %c0_71 = arith.constant 0 : index
    %88 = vector.load %arg7[%c8_69, %c0_70, %c0_71] : memref<9x4x4xbf16, #tpu.memory_space<vmem>>, vector<1x4x4xbf16>
    %89 = vector.shape_cast %88 : vector<1x4x4xbf16> to vector<4x4xbf16>
    %cst_72 = arith.constant dense<0.000000e+00> : vector<128x4xf32>
    %90 = tpu.matmul %87, %89, %cst_72 {dimension_numbers = #tpu.dot_dimension_numbers<[1], [0], [0], [1], [0, 0, 1, 1], [], []>} : vector<128x4xbf16>, vector<4x4xbf16>, vector<128x4xf32> -> vector<128x4xf32>
    %91 = arith.addf %85, %90 : vector<128x4xf32>
    %92 = tpu.iota {dimensions = array<i32: 0>} : vector<128x1xi32>
    %c16_i32 = arith.constant 16 : i32
    %c0_i32_73 = arith.constant 0 : i32
    %93 = arith.cmpi eq, %c16_i32, %c0_i32_73 : i32
    %c1_i32_74 = arith.constant 1 : i32
    %94 = arith.select %93, %c1_i32_74, %c16_i32 : i32
    %95 = vector.broadcast %94 : i32 to vector<128x1xi32>
    %96 = arith.remsi %92, %95 : vector<128x1xi32>
    %c0_i32_75 = arith.constant 0 : i32
    %97 = vector.broadcast %c0_i32_75 : i32 to vector<128x1xi32>
    %98 = arith.cmpi ne, %96, %97 : vector<128x1xi32>
    %c0_i32_76 = arith.constant 0 : i32
    %99 = vector.broadcast %c0_i32_76 : i32 to vector<128x1xi32>
    %100 = arith.cmpi slt, %96, %99 : vector<128x1xi32>
    %c0_i32_77 = arith.constant 0 : i32
    %101 = arith.cmpi slt, %94, %c0_i32_77 : i32
    %102 = vector.broadcast %101 : i1 to vector<128x1xi1>
    %103 = vector.broadcast %102 : vector<128x1xi1> to vector<128x1xi1>
    %104 = arith.xori %100, %103 : vector<128x1xi1>
    %105 = arith.andi %104, %98 : vector<128x1xi1>
    %106 = vector.broadcast %94 : i32 to vector<128x1xi32>
    %107 = arith.addi %96, %106 : vector<128x1xi32>
    %108 = arith.select %105, %107, %96 : vector<128x1xi1>, vector<128x1xi32>
    %c0_i32_78 = arith.constant 0 : i32
    %109 = vector.broadcast %c0_i32_78 : i32 to vector<128x1xi32>
    %110 = arith.cmpi sgt, %108, %109 : vector<128x1xi32>
    %cst_79 = arith.constant 0.000000e+00 : f32
    %111 = vector.shape_cast %110 : vector<128x1xi1> to vector<128x1xi1>
    %112 = vector.broadcast %111 : vector<128x1xi1> to vector<128x4xi1>
    %113 = vector.broadcast %cst_79 : f32 to vector<128x4xf32>
    %114 = arith.select %112, %57, %113 : vector<128x4xi1>, vector<128x4xf32>
    %115 = arith.addf %74, %114 : vector<128x4xf32>
    %c15_i32 = arith.constant 15 : i32
    %116 = vector.broadcast %c15_i32 : i32 to vector<128x1xi32>
    %117 = arith.cmpi slt, %108, %116 : vector<128x1xi32>
    %cst_80 = arith.constant 0.000000e+00 : f32
    %118 = vector.shape_cast %117 : vector<128x1xi1> to vector<128x1xi1>
    %119 = vector.broadcast %118 : vector<128x1xi1> to vector<128x4xi1>
    %120 = vector.broadcast %cst_80 : f32 to vector<128x4xf32>
    %121 = arith.select %119, %91, %120 : vector<128x4xi1>, vector<128x4xf32>
    %122 = arith.addf %115, %121 : vector<128x4xf32>
    %c0_81 = arith.constant 0 : index
    %c0_82 = arith.constant 0 : index
    %123 = vector.load %arg8[%c0_81, %c0_82] : memref<1x4xf32, #tpu.memory_space<vmem>>, vector<1x4xf32>
    %124 = vector.broadcast %123 : vector<1x4xf32> to vector<128x4xf32>
    %125 = arith.addf %122, %124 : vector<128x4xf32>
    %cst_83 = arith.constant 0.000000e+00 : f32
    %126 = vector.broadcast %cst_83 : f32 to vector<128x4xf32>
    %127 = arith.maximumf %125, %126 : vector<128x4xf32>
    %128 = arith.truncf %127 : vector<128x4xf32> to vector<128x4xbf16>
    %c0_84 = arith.constant 0 : index
    %c0_85 = arith.constant 0 : index
    %129 = vector.load %arg9[%c0_84, %c0_85] : memref<4x16xbf16, #tpu.memory_space<vmem>>, vector<4x16xbf16>
    %cst_86 = arith.constant dense<0.000000e+00> : vector<128x16xf32>
    %130 = tpu.matmul %128, %129, %cst_86 {dimension_numbers = #tpu.dot_dimension_numbers<[1], [0], [0], [1], [0, 0, 1, 1], [], []>} : vector<128x4xbf16>, vector<4x16xbf16>, vector<128x16xf32> -> vector<128x16xf32>
    %c0_87 = arith.constant 0 : index
    %c0_88 = arith.constant 0 : index
    %131 = vector.load %arg10[%c0_87, %c0_88] : memref<1x16xf32, #tpu.memory_space<vmem>>, vector<1x16xf32>
    %132 = vector.broadcast %131 : vector<1x16xf32> to vector<128x16xf32>
    %133 = arith.addf %130, %132 : vector<128x16xf32>
    %134 = arith.extf %1 : vector<128x16xbf16> to vector<128x16xf32>
    %135 = arith.addf %133, %134 : vector<128x16xf32>
    %cst_89 = arith.constant 0.000000e+00 : f32
    %136 = vector.broadcast %cst_89 : f32 to vector<128x16xf32>
    %137 = arith.maximumf %135, %136 : vector<128x16xf32>
    %138 = vector.shape_cast %137 : vector<128x16xf32> to vector<1x128x16xf32>
    %139 = arith.truncf %138 : vector<1x128x16xf32> to vector<1x128x16xbf16>
    %c0_90 = arith.constant 0 : index
    %c0_91 = arith.constant 0 : index
    %c0_92 = arith.constant 0 : index
    %140 = vector.load %arg11[%c0_90, %c0_91, %c0_92] : memref<1x128x16xbf16, #tpu.memory_space<vmem>>, vector<1x128x16xbf16>
    tpu.vector_store %arg11[%c0_90, %c0_91, %c0_92], %139 {strides = array<i32>} : memref<1x128x16xbf16, #tpu.memory_space<vmem>>, vector<1x128x16xbf16>,
    return
  }
  func.func @transform_0(%arg0: i32, %arg1: i32) -> (i32, i32, i32) {
    %c0_i32 = arith.constant 0 : i32
    %c0_i32_0 = arith.constant 0 : i32
    return %arg0, %arg1, %c0_i32 : i32, i32, i32
  }
  func.func @transform_1(%arg0: i32, %arg1: i32) -> (i32, i32, i32) {
    %c8_i32 = arith.constant 8 : i32
    %0 = arith.muli %arg1, %c8_i32 : i32
    %c1_i32 = arith.constant 1 : i32
    %1 = arith.subi %0, %c1_i32 : i32
    %c0_i32 = arith.constant 0 : i32
    %2 = arith.maxsi %1, %c0_i32 : i32
    %c0_i32_0 = arith.constant 0 : i32
    %c0_i32_1 = arith.constant 0 : i32
    return %arg0, %2, %c0_i32_0 : i32, i32, i32
  }
  func.func @transform_2(%arg0: i32, %arg1: i32) -> (i32, i32, i32) {
    %c1_i32 = arith.constant 1 : i32
    %0 = arith.addi %arg1, %c1_i32 : i32
    %c8_i32 = arith.constant 8 : i32
    %1 = arith.muli %0, %c8_i32 : i32
    %c15_i32 = arith.constant 15 : i32
    %2 = arith.minsi %1, %c15_i32 : i32
    %c0_i32 = arith.constant 0 : i32
    %c0_i32_0 = arith.constant 0 : i32
    return %arg0, %2, %c0_i32 : i32, i32, i32
  }
  func.func @transform_3(%arg0: i32, %arg1: i32) -> (i32, i32) {
    %c0_i32 = arith.constant 0 : i32
    %c0_i32_0 = arith.constant 0 : i32
    %c0_i32_1 = arith.constant 0 : i32
    return %c0_i32, %c0_i32_0 : i32, i32
  }
  func.func @transform_4(%arg0: i32, %arg1: i32) -> (i32, i32) {
    %c0_i32 = arith.constant 0 : i32
    %c0_i32_0 = arith.constant 0 : i32
    %c0_i32_1 = arith.constant 0 : i32
    return %c0_i32, %c0_i32_0 : i32, i32
  }
  func.func @transform_5(%arg0: i32, %arg1: i32) -> (i32, i32, i32) {
    %c0_i32 = arith.constant 0 : i32
    %c0_i32_0 = arith.constant 0 : i32
    %c0_i32_1 = arith.constant 0 : i32
    %c0_i32_2 = arith.constant 0 : i32
    return %c0_i32, %c0_i32_0, %c0_i32_1 : i32, i32, i32
  }
  func.func @transform_6(%arg0: i32, %arg1: i32) -> (i32, i32) {
    %c0_i32 = arith.constant 0 : i32
    %c0_i32_0 = arith.constant 0 : i32
    %c0_i32_1 = arith.constant 0 : i32
    return %c0_i32, %c0_i32_0 : i32, i32
  }
  func.func @transform_7(%arg0: i32, %arg1: i32) -> (i32, i32) {
    %c0_i32 = arith.constant 0 : i32
    %c0_i32_0 = arith.constant 0 : i32
    %c0_i32_1 = arith.constant 0 : i32
    return %c0_i32, %c0_i32_0 : i32, i32
  }
  func.func @transform_8(%arg0: i32, %arg1: i32) -> (i32, i32) {
    %c0_i32 = arith.constant 0 : i32
    %c0_i32_0 = arith.constant 0 : i32
    %c0_i32_1 = arith.constant 0 : i32
    return %c0_i32, %c0_i32_0 : i32, i32
  }
  func.func @transform_9(%arg0: i32, %arg1: i32) -> (i32, i32, i32) {
    %c0_i32 = arith.constant 0 : i32
    %c0_i32_0 = arith.constant 0 : i32
    return %arg0, %arg1, %c0_i32 : i32, i32, i32
  }
}

</mosaic_0001>

<bundles_post_ra>
// kernel: tpu_custom_call.1
= control target key start
LH: loop header
LB: loop body
LE: loop exit
PB: predicated region body
PF: predicated region fallthrough
CT: control target
= control target key end

     0   :  { %s3614_s30 = smov 0   ;;  %s3616_s10 = smov 0   ;;  %s4256_s0 = inlined_call_operand.vmem [shape: bf16[2,256,16], index: 0, kind: input, shape index: {}]   ;;  %s4257_s1 = inlined_call_operand.vmem [shape: bf16[2,256,16], index: 1, kind: input, shape index: {}]   ;;  %s4258_s2 = inlined_call_operand.vmem [shape: bf16[2,256,16], index: 2, kind: input, shape index: {}]   ;;  %s4259_s3 = inlined_call_operand.vmem [shape: bf16[16,4], index: 3, kind: input, shape index: {}]   ;;  %s4260_s4 = inlined_call_operand.vmem [shape: f32[1,4], index: 4, kind: input, shape index: {}]   ;;  %s4261_s5 = inlined_call_operand.vmem [shape: bf16[9,4,4], index: 5, kind: input, shape index: {}]   ;;  %s4262_s6 = inlined_call_operand.vmem [shape: f32[1,4], index: 6, kind: input, shape index: {}]   ;;  %s4263_s7 = inlined_call_operand.vmem [shape: bf16[4,16], index: 7, kind: input, shape index: {}]   ;;  %s4264_s8 = inlined_call_operand.vmem [shape: f32[1,16], index: 8, kind: input, shape index: {}]   ;;  %s4265_s9 = inlined_call_operand.vmem [shape: bf16[2,256,16], index: 9, kind: output, shape index: {}]  }
   0x1   :  { %s3618_s11 = smov 0   ;;  %s3620_s12 = smov 0  }
   0x2   :  { %s3622_s13 = smov 0  }
   0x3 LB: > { %s28_s14 = sadd.s32 1, %s3550_s11  ;;  %s31_s15 = sadd.s32 1, %s3554_s12  ;;  %s3558_s13 = sphi %s3622_s13, %s19_s13   ;;  %s3554_s12 = sphi %s3620_s12, %s4327_s12   ;;  %s3550_s11 = sphi %s3618_s11, %s4326_s11   ;;  %s3546_s10 = sphi %s3616_s10, %s4325_s10   ;;  %s3542_s30 = sphi %s3614_s30, %s4324_s30  }
   0x4   : > { %p29_p0 = scmp.ge.s32.totalorder %s28_s14, 2  ;;  %p2957_p1 = scmp.ge.s32.totalorder %s3558_s13, 1 }
   0x5   : > { %p374_p2 = scmp.lt.s32.totalorder %s3558_s13, 5 }
   0x6   : > { %s4329_s14 = smov (%p29_p0, %s28_s14), 0  ;;  %s4331_s15 = smov (!%p29_p0, %s31_s15), %s3554_s12 }
   0x7   : > { %p375_p3 = pnand %p2957_p1, %p374_p2  ;;  %p33_p4 = scmp.ge.s32.totalorder %s4331_s15, 2 }
   0x9   : > { %s4333_s15 = smov (%p33_p4, %s4331_s15), 0  ;;  %378 = sbr.rel (%p375_p3) target bundleno = 846 (0x34e), region = 56 }
   0xe   : > { %v3500_v0 = vld [vmem:[%s4259_s3] sm:$0xff]   ;;  %s2958_s18 = sshll.u32 %s3542_s30, 4  ;;  %p445_p5 = scmp.lt.s32.totalorder %s3546_s10, 1  ;;  %v3560_v1 = vmov 0.0   ;;  %vm572_vm0 = vcmask 130048   ;;  %vm3561_vm1 = vmmov 0  }
   0xf   : > { %p447_p6 = scmp.lt.s32.totalorder %s2958_s18, 31  ;;  %3234 = vmatprep.subr.bf16.mxu0 %v3500_v0  ;;  %3444 = vmatprep.subr.bf16.mxu1 %v3500_v0  ;;  %s2961_s19 = sshll.u32 %s3542_s30, 3  ;;  %v3505_v6 = vld [vmem:[%s4259_s3] sm:$0xff]   ;;  %vm710_vm2 = vcmask 31744  }
  0x10   : > { %3235 = vmatpush3.bf16.msra.mxu0 %v3500_v0  ;;  %3445 = vmatpush3.bf16.msra.mxu1 %v3500_v0  ;;  %s4335_s10 = smov (!%p445_p5, %s3546_s10), 1  ;;  %s2962_s21 = sadd.s32 4294967295, %s2961_s19  ;;  %v3722_v13 = vld [vmem:[%s4260_s4] ss:$0 sm:$0xff] }
  0x11   : > { %s4337_s18 = smov (!%p447_p6, %s2958_s18), 31  ;;  %3252 = vmatprep.subr.bf16.mxu1 %v3560_v1  ;;  %s3651_s20 = sshll.u32 %s4335_s10, 5 }
  0x12   : > { %s450_s22 = sadd.s32 %s3651_s20, %s4337_s18  ;;  %p456_p7 = scmp.gt.s32.totalorder %s2962_s21, 0 }
  0x13   : > { %s2960_s23 = sshll.u32 %s450_s22, 2  ;;  %s3114_s24 = sadd.s32 8, %s2961_s19 }
  0x14   : > { %s3657_s27 = scalar_lea.vmem %s4256_s0, %s2960_s23  ;;  %s3662_s10 = scalar_lea.vmem %s4265_s9, %s2960_s23 }
  0x15   : > { %v3665_v2 = vld [vmem:[%s3657_s27] sm:$0xff]   ;;  %v3668_v3 = vld [vmem:[%s3657_s27 + $0x30] sm:$0xff]   ;;  %v3671_v4 = vld [vmem:[%s3657_s27 + $0x8] sm:$0xff]   ;;  %s4339_s21 = smov (!%p456_p7, %s2962_s21), 0  ;;  %p474_p8 = scmp.lt.s32.totalorder %s3114_s24, 15 }
  0x16   : > { %4282 = vst [vmem:[#allocation3_spill] sm:$0xff] %v3665_v2  ;;  %4283 = vst [vmem:[#allocation4_spill] sm:$0xff] %v3668_v3  ;;  %v3674_v5 = vld [vmem:[%s3657_s27 + $0x38] sm:$0xff]   ;;  %v3680_v7 = vld [vmem:[%s3657_s27 + $0x10] sm:$0xff]   ;;  %s2963_s18 = sshll.u32 %s4339_s21, 1  ;;  %3236 = vmatprep.mubr.msk.bf16.mxu0 %vm572_vm0, %v3665_v2  ;;  %3248 = vmatprep.mubr.msk.bf16.mxu1 %vm572_vm0, %v3668_v3  ;;  %p2997_p11 = scmp.le.s32.totalorder %s3542_s30, 0 }
  0x17   : > { %4284 = vst [vmem:[#allocation5_spill] sm:$0xff] %v3671_v4  ;;  %4285 = vst [vmem:[#allocation6_spill] sm:$0xff] %v3674_v5  ;;  %p461_p9 = scmp.lt.s32.totalorder %s2963_s18, 31  ;;  %3237 = vmatmul.mubr.msk.bf16.vlgmr.msra.gmra.mxu0 %vm572_vm0, %v3671_v4  ;;  %3249 = vmatmul.mubr.msk.bf16.vlgmr.msra.gmra.mxu1 %vm572_vm0, %v3674_v5  ;;  %s4341_s24 = smov (!%p474_p8, %s3114_s24), 15  ;;  %v3693_v8 = vld [vmem:[%s3657_s27 + $0x18] sm:$0xff]   ;;  %v3697_v9 = vld [vmem:[%s3657_s27 + $0x20] sm:$0xff]  }
  0x18   : > { %4286 = vst [vmem:[#allocation7_spill] sm:$0xff] %v3680_v7  ;;  %3253 = vmatpush3.bf16.msra.mxu1 %v3505_v6  ;;  %3240 = vmatprep.mubr.msk.bf16.mxu0 %vm572_vm0, %v3680_v7  ;;  %4287 = vst [vmem:[#allocation8_spill] sm:$0xff] %v3693_v8  ;;  %s2967_s19 = sshll.u32 %s4341_s24, 1  ;;  %v3710_v11 = vld [vmem:[%s3657_s27 + $0x28] sm:$0xff]  }
  0x19   : > { %s4343_s18 = smov (!%p461_p9, %s2963_s18), 31  ;;  %3254 = vmatprep.mubr.msk.bf16.mxu1 %vm3561_vm1, %v3560_v1  ;;  %3258 = vmatprep.subr.bf16.mxu1 %v3560_v1  ;;  %4288 = vst [vmem:[#allocation9_spill] sm:$0xff] %v3697_v9  ;;  %p479_p10 = scmp.lt.s32.totalorder %s2967_s19, 31  ;;  %4289 = vst [vmem:[#allocation10_spill] sm:$0xff] %v3710_v11 }
  0x1a   : > { %s464_s21 = sadd.s32 %s3651_s20, %s4343_s18 }
  0x1b   : > { %s2965_s22 = sshll.u32 %s464_s21, 2  ;;  %s4345_s19 = smov (!%p479_p10, %s2967_s19), 31 }
  0x1c   : > { %s466_s26 = scalar_lea.vmem %s4257_s1, %s2965_s22  ;;  %s482_s28 = sadd.s32 %s3651_s20, %s4345_s19 }
  0x1d   : > { %v3508_v10 = vld [vmem:[%s466_s26] sm:$0xff]   ;;  %s2969_s24 = sshll.u32 %s482_s28, 2 }
  0x1e   : > { %s484_s17 = scalar_lea.vmem %s4258_s2, %s2969_s24 }
  0x1f   : > { %3241 = vmatmul.mubr.msk.bf16.gmra.mxu0 %vm572_vm0, %v3693_v8  ;;  %3255 = vmatmul.mubr.msk.bf16.vlgmr.msra.gmra.mxu1 %vm572_vm0, %v3508_v10  ;;  %v3511_v12 = vld [vmem:[%s484_s17] sm:$0xff]  }
  0x20   : > { %3259 = vmatpush3.bf16.msra.mxu1 %v3505_v6  ;;  %3244 = vmatprep.mubr.msk.bf16.mxu0 %vm572_vm0, %v3697_v9 }
  0x21   : > { %3260 = vmatprep.mubr.msk.bf16.mxu1 %vm3561_vm1, %v3560_v1 }
  0x27   : > { %3245 = vmatmul.mubr.msk.bf16.gmra.mxu0 %vm572_vm0, %v3710_v11  ;;  %3261 = vmatmul.mubr.msk.bf16.vlgmr.msra.gmra.mxu1 %vm572_vm0, %v3511_v12 }
  0xd7   : > { %v3238_v14 = vpop.f32.mrf.mxu0  ;;  %v3250_v15 = vpop.f32.mrf.mxu1 }
  0xd8   : > { %v640_v16 = vadd.f32 %v3238_v14, %v3722_v13  ;;  %v688_v17 = vadd.f32 %v3250_v15, %v3722_v13 }
  0xd9   : > { %v631_v18 = vpop.f32.mrf.mxu0  ;;  %v679_v19 = vpop.f32.mrf.mxu1 }
  0xda   : > { %v696_v20 = vmax.f32 %v640_v16, 0.0  ;;  %v708_v21 = vmax.f32 %v688_v17, 0.0  ;;  %v632_v22 = vadd.f32 %v3722_v13, %v631_v18  ;;  %v680_v23 = vadd.f32 %v3722_v13, %v679_v19 }
  0xdb   : > { %v3239_v24 = vpop.f32.mrf.mxu0  ;;  %v3251_v25 = vpop.f32.mrf.mxu1 }
  0xdc   : > { %713 = vst.msk [vmem:[#allocation2 + $0x28] sm:$0xff] %vm710_vm2, %v696_v20  ;;  %725 = vst.msk [vmem:[#allocation2 + $0x88] sm:$0xff] %vm710_vm2, %v708_v21  ;;  %v694_v26 = vmax.f32 %v632_v22, 0.0  ;;  %v706_v27 = vmax.f32 %v680_v23, 0.0  ;;  %v643_v28 = vadd.f32 %v3239_v24, %v3722_v13  ;;  %v691_v29 = vadd.f32 %v3251_v25, %v3722_v13 }
  0xdd   : > { %v634_v30 = vpop.f32.mrf.mxu0  ;;  %v682_v31 = vpop.f32.mrf.mxu1 }
  0xde   : > { %711 = vst.msk [vmem:[#allocation2 + $0x18] sm:$0xff] %vm710_vm2, %v694_v26  ;;  %723 = vst.msk [vmem:[#allocation2 + $0x78] sm:$0xff] %vm710_vm2, %v706_v27  ;;  %v697_v32 = vmax.f32 %v643_v28, 0.0  ;;  %v709_v33 = vmax.f32 %v691_v29, 0.0  ;;  %v635_v34 = vadd.f32 %v3722_v13, %v634_v30  ;;  %v683_v35 = vadd.f32 %v3722_v13, %v682_v31 }
  0xdf   : > { %v3242_v36 = vpop.f32.mrf.mxu0  ;;  %v786_v37 = vpop.f32.mrf.mxu1 }
  0xe0   : > { %714 = vst.msk [vmem:[#allocation2 + $0x30] sm:$0xff] %vm710_vm2, %v697_v32  ;;  %726 = vst.msk [vmem:[#allocation2 + $0x90] sm:$0xff] %vm710_vm2, %v709_v33  ;;  %v695_v38 = vmax.f32 %v635_v34, 0.0  ;;  %v707_v39 = vmax.f32 %v683_v35, 0.0  ;;  %v656_v40 = vadd.f32 %v3242_v36, %v3722_v13  ;;  %v787_v41 = vadd.f32 %v3722_v13, %v786_v37 }
  0xe1   : > { %v647_v42 = vpop.f32.mrf.mxu0  ;;  %v3256_v43 = vpop.f32.mrf.mxu1 }
  0xe2   : > { %712 = vst.msk [vmem:[#allocation2 + $0x20] sm:$0xff] %vm710_vm2, %v695_v38  ;;  %724 = vst.msk [vmem:[#allocation2 + $0x80] sm:$0xff] %vm710_vm2, %v707_v39  ;;  %v700_v44 = vmax.f32 %v656_v40, 0.0  ;;  %v793_v45 = vmax.f32 %v787_v41, 0.0  ;;  %v648_v46 = vadd.f32 %v3722_v13, %v647_v42 }
  0xe3   : > { %v3243_v47 = vpop.f32.mrf.mxu0  ;;  %v789_v48 = vpop.f32.mrf.mxu1 }
  0xe4   : > { %717 = vst.msk [vmem:[#allocation2 + $0x48] sm:$0xff] %vm710_vm2, %v700_v44  ;;  %v698_v49 = vmax.f32 %v648_v46, 0.0  ;;  %v659_v50 = vadd.f32 %v3243_v47, %v3722_v13  ;;  %v790_v51 = vadd.f32 %v3722_v13, %v789_v48 }
  0xe5   : > { %v650_v52 = vpop.f32.mrf.mxu0  ;;  %v3257_v53 = vpop.f32.mrf.mxu1 }
  0xe6   : > { %715 = vst.msk [vmem:[#allocation2 + $0x38] sm:$0xff] %vm710_vm2, %v698_v49  ;;  %v701_v54 = vmax.f32 %v659_v50, 0.0  ;;  %v794_v55 = vmax.f32 %v790_v51, 0.0  ;;  %v651_v56 = vadd.f32 %v3722_v13, %v650_v52 }
  0xe7   : > { %v3246_v57 = vpop.f32.mrf.mxu0  ;;  %v839_v58 = vpop.f32.mrf.mxu1 }
  0xe8   : > { %718 = vst.msk [vmem:[#allocation2 + $0x50] sm:$0xff] %vm710_vm2, %v701_v54  ;;  %v699_v59 = vmax.f32 %v651_v56, 0.0  ;;  %v672_v60 = vadd.f32 %v3246_v57, %v3722_v13  ;;  %v840_v61 = vadd.f32 %v3722_v13, %v839_v58 }
  0xe9   : > { %v663_v62 = vpop.f32.mrf.mxu0  ;;  %v3262_v63 = vpop.f32.mrf.mxu1 }
  0xea   : > { %716 = vst.msk [vmem:[#allocation2 + $0x40] sm:$0xff] %vm710_vm2, %v699_v59  ;;  %v704_v0 = vmax.f32 %v672_v60, 0.0  ;;  %v846_v1 = vmax.f32 %v840_v61, 0.0  ;;  %v664_v6 = vadd.f32 %v3722_v13, %v663_v62 }
  0xeb   : > { %v3247_v10 = vpop.f32.mrf.mxu0  ;;  %v842_v12 = vpop.f32.mrf.mxu1 }
  0xec   : > { %721 = vst.msk [vmem:[#allocation2 + $0x68] sm:$0xff] %vm710_vm2, %v704_v0  ;;  %v702_v14 = vmax.f32 %v664_v6, 0.0  ;;  %v675_v15 = vadd.f32 %v3247_v10, %v3722_v13  ;;  %v843_v16 = vadd.f32 %v3722_v13, %v842_v12 }
  0xed   : > { %v666_v17 = vpop.f32.mrf.mxu0  ;;  %v3263_v18 = vpop.f32.mrf.mxu1 }
  0xee   : > { %719 = vst.msk [vmem:[#allocation2 + $0x58] sm:$0xff] %vm710_vm2, %v702_v14  ;;  %v705_v19 = vmax.f32 %v675_v15, 0.0  ;;  %v847_v20 = vmax.f32 %v843_v16, 0.0  ;;  %v667_v21 = vadd.f32 %v3722_v13, %v666_v17  ;;  %851 = sbr.rel (%p2997_p11) target bundleno = 244 (0xf4), region = 60 }
  0xf0   : > { %722 = vst.msk [vmem:[#allocation2 + $0x70] sm:$0xff] %vm710_vm2, %v705_v19  ;;  %v703_v22 = vmax.f32 %v667_v21, 0.0 }
  0xf2   : > { %720 = vst.msk [vmem:[#allocation2 + $0x60] sm:$0xff] %vm710_vm2, %v703_v22 }
  0xf3   : > { %852 = vst.msk [vmem:[#allocation2 + $0x8] sm:$0xff] %vm710_vm2, %v793_v45  ;;  %853 = vst.msk [vmem:[#allocation2 + $0x10] sm:$0xff] %vm710_vm2, %v794_v55 }
  0xf4 PF: > { %p2998_p12 = scmp.ne.s32.totalorder %s3542_s30, 0 }
  0xf6   : > { %857 = sbr.rel (%p2998_p12) target bundleno = 253 (0xfd), region = 64 }
  0xfb   : > { %v3562_v23 = vmov 0.0  }
  0xfc   : > { %858 = vst.msk [vmem:[#allocation2 + $0x8] sm:$0xff] %vm710_vm2, %v3562_v23  ;;  %859 = vst.msk [vmem:[#allocation2 + $0x10] sm:$0xff] %vm710_vm2, %v3562_v23 }
  0xfd PF: > { %p2999_p13 = scmp.ge.s32.totalorder %s3542_s30, 1 }
  0xff   : > { %863 = sbr.rel (%p2999_p13) target bundleno = 261 (0x105), region = 68 }
 0x104   : > { %864 = vst.msk [vmem:[#allocation2 + $0x98] sm:$0xff] %vm710_vm2, %v846_v1  ;;  %865 = vst.msk [vmem:[#allocation2 + $0xa0] sm:$0xff] %vm710_vm2, %v847_v20 }
 0x105 PF: > { %p3000_p0 = scmp.ne.s32.totalorder %s3542_s30, 1 }
 0x107   : > { %869 = sbr.rel (%p3000_p0) target bundleno = 270 (0x10e), region = 72 }
 0x10c   : > { %v3563_v13 = vmov 0.0  }
 0x10d   : > { %870 = vst.msk [vmem:[#allocation2 + $0x98] sm:$0xff] %vm710_vm2, %v3563_v13  ;;  %871 = vst.msk [vmem:[#allocation2 + $0xa0] sm:$0xff] %vm710_vm2, %v3563_v13 }
 0x10e PF: > { %v3001_v24 = vld [vmem:[%s4261_s5 + $0x6] sm:$0x3]  ;;  %vm926_vm3 = vcmask 1041408   ;;  %v896_v25 = vld [vmem:[%s4261_s5] sm:$0x3]  ;;  %v874_v26 = vld [vmem:[#allocation2 + $0x17] sm:$0xff] }
 0x10f   : > { %3446 = vmatprep.subr.msk.bf16.mxu1 %vm926_vm3, %v3001_v24  ;;  %3447 = vmatprep.subr.msk.bf16.mxu0 %vm926_vm3, %v896_v25  ;;  %v928_v27 = vsel %vm926_vm3, %v3001_v24, 0  ;;  %v1031_v28 = vsel %vm926_vm3, %v896_v25, 0  ;;  %v875_v29 = vld [vmem:[#allocation2 + $0x1f] sm:$0xff]  ;;  %v872_v30 = vld [vmem:[#allocation2 + $0x7] sm:$0xff]  ;;  %v873_v31 = vld [vmem:[#allocation2 + $0xf] sm:$0xff] }
 0x110   : > { %3265 = vmatpush3.bf16.msra.mxu1 %v928_v27  ;;  %3283 = vmatpush3.bf16.msra.mxu0 %v1031_v28  ;;  %v889_v32 = vpack.c.bf16 %v875_v29, %v874_v26  ;;  %v888_v33 = vpack.c.bf16 %v873_v31, %v872_v30  ;;  %v876_v34 = vld [vmem:[#allocation2 + $0x27] sm:$0xff]  ;;  %v877_v35 = vld [vmem:[#allocation2 + $0x2f] sm:$0xff]  ;;  %v878_v39 = vld [vmem:[#allocation2 + $0x37] sm:$0xff] }
 0x111   : > { %v3018_v36 = vld [vmem:[%s4261_s5 + $0xc] sm:$0x3]  ;;  %v890_v37 = vpack.c.bf16 %v877_v35, %v876_v34  ;;  %v879_v40 = vld [vmem:[#allocation2 + $0x3f] sm:$0xff]  ;;  %v881_v43 = vld [vmem:[#allocation2 + $0x4f] sm:$0xff] }
 0x112   : > { %3448 = vmatprep.subr.msk.bf16.mxu1 %vm926_vm3, %v3018_v36  ;;  %v1181_v38 = vsel %vm926_vm3, %v3018_v36, 0  ;;  %3266 = vmatprep.mubr.msk.bf16.mxu1 %vm710_vm2, %v889_v32  ;;  %v891_v41 = vpack.c.bf16 %v879_v40, %v878_v39  ;;  %v880_v42 = vld [vmem:[#allocation2 + $0x47] sm:$0xff]  ;;  %v882_v44 = vld [vmem:[#allocation2 + $0x57] sm:$0xff]  ;;  %v883_v45 = vld [vmem:[#allocation2 + $0x5f] sm:$0xff] }
 0x113   : > { %3284 = vmatprep.mubr.msk.bf16.mxu0 %vm710_vm2, %v888_v33  ;;  %3267 = vmatmul.mubr.msk.bf16.vlgmr.msra.gmra.mxu1 %vm710_vm2, %v890_v37  ;;  %v3028_v46 = vld [vmem:[%s4261_s5 + $0x8] sm:$0x3]  ;;  %v3027_v48 = vld [vmem:[%s4261_s5 + $0x2] sm:$0x3]  ;;  %v892_v49 = vpack.c.bf16 %v881_v43, %v880_v42  ;;  %v893_v50 = vpack.c.bf16 %v883_v45, %v882_v44  ;;  %v3045_v51 = vld [vmem:[%s4261_s5 + $0xe] sm:$0x3] }
 0x114   : > { %3285 = vmatmul.mubr.msk.bf16.vlgmr.msra.gmra.mxu0 %vm710_vm2, %v889_v32  ;;  %3301 = vmatpush3.bf16.msra.mxu1 %v1181_v38  ;;  %v1352_v47 = vsel %vm926_vm3, %v3028_v46, 0  ;;  %v884_v52 = vld [vmem:[#allocation2 + $0x67] sm:$0xff]  ;;  %v885_v53 = vld [vmem:[#allocation2 + $0x6f] sm:$0xff]  ;;  %v886_v54 = vld [vmem:[#allocation2 + $0x77] sm:$0xff]  ;;  %v1455_v14 = vsel %vm926_vm3, %v3027_v48, 0  ;;  %v1605_v16 = vsel %vm926_vm3, %v3045_v51, 0 }
 0x115   : > { %3270 = vmatprep.mubr.msk.bf16.mxu1 %vm710_vm2, %v891_v41  ;;  %3288 = vmatprep.mubr.msk.bf16.mxu0 %vm710_vm2, %v890_v37  ;;  %v887_v55 = vld [vmem:[#allocation2 + $0x7f] sm:$0xff]  ;;  %v894_v56 = vpack.c.bf16 %v885_v53, %v884_v52  ;;  %v897_v58 = vld [vmem:[#allocation2 + $0x87] sm:$0xff]  ;;  %v898_v59 = vld [vmem:[#allocation2 + $0x8f] sm:$0xff] }
 0x116   : > { %3449 = vmatprep.subr.msk.bf16.mxu0 %vm926_vm3, %v3028_v46  ;;  %3450 = vmatprep.subr.msk.bf16.mxu1 %vm926_vm3, %v3027_v48  ;;  %v895_v57 = vpack.c.bf16 %v887_v55, %v886_v54  ;;  %v1298_v60 = vld [vmem:[#allocation2 + $0x18] sm:$0xff]  ;;  %v1299_v61 = vld [vmem:[#allocation2 + $0x20] sm:$0xff]  ;;  %v899_v62 = vpack.c.bf16 %v898_v59, %v897_v58  ;;  %v1300_v0 = vld [vmem:[#allocation2 + $0x28] sm:$0xff] }
 0x117   : > { %3319 = vmatpush3.bf16.msra.mxu0 %v1352_v47  ;;  %v1313_v63 = vpack.c.bf16 %v1299_v61, %v1298_v60  ;;  %v1301_v1 = vld [vmem:[#allocation2 + $0x30] sm:$0xff]  ;;  %v1302_v6 = vld [vmem:[#allocation2 + $0x38] sm:$0xff]  ;;  %v1303_v10 = vld [vmem:[#allocation2 + $0x40] sm:$0xff] }
 0x118   : > { %3451 = vmatprep.subr.msk.bf16.mxu0 %vm926_vm3, %v3045_v51  ;;  %v1314_v12 = vpack.c.bf16 %v1301_v1, %v1300_v0  ;;  %v1315_v15 = vpack.c.bf16 %v1303_v10, %v1302_v6  ;;  %v3055_v17 = vld [vmem:[%s4261_s5 + $0xa] sm:$0x3]  ;;  %v3054_v18 = vld [vmem:[%s4261_s5 + $0x4] sm:$0x3]  ;;  %v1305_v20 = vld [vmem:[#allocation2 + $0x50] sm:$0xff] }
 0x119   : > { %v1304_v19 = vld [vmem:[#allocation2 + $0x48] sm:$0xff]  ;;  %v1306_v21 = vld [vmem:[#allocation2 + $0x58] sm:$0xff]  ;;  %v1307_v22 = vld [vmem:[#allocation2 + $0x60] sm:$0xff]  ;;  %v1776_v39 = vsel %vm926_vm3, %v3055_v17, 0  ;;  %v1879_v40 = vsel %vm926_vm3, %v3054_v18, 0 }
 0x11a   : > { %v1316_v23 = vpack.c.bf16 %v1305_v20, %v1304_v19  ;;  %v1317_v13 = vpack.c.bf16 %v1307_v22, %v1306_v21  ;;  %v1308_v24 = vld [vmem:[#allocation2 + $0x68] sm:$0xff]  ;;  %v1309_v25 = vld [vmem:[#allocation2 + $0x70] sm:$0xff]  ;;  %v1310_v26 = vld [vmem:[#allocation2 + $0x78] sm:$0xff] }
 0x11b   : > { %3271 = vmatmul.mubr.msk.bf16.gmra.mxu1 %vm710_vm2, %v892_v49  ;;  %v1311_v27 = vld [vmem:[#allocation2 + $0x80] sm:$0xff]  ;;  %v1318_v28 = vpack.c.bf16 %v1309_v25, %v1308_v24  ;;  %v1144_v30 = vld [vmem:[#allocation2 + $0x97] sm:$0xff]  ;;  %v1322_v32 = vld [vmem:[#allocation2 + $0x88] sm:$0xff] }
 0x11c   : > { %3289 = vmatmul.mubr.msk.bf16.gmra.mxu0 %vm710_vm2, %v891_v41  ;;  %3274 = vmatprep.mubr.msk.bf16.mxu1 %vm710_vm2, %v893_v50  ;;  %v1319_v29 = vpack.c.bf16 %v1311_v27, %v1310_v26  ;;  %v1145_v31 = vld [vmem:[#allocation2 + $0x9f] sm:$0xff]  ;;  %v1323_v33 = vld [vmem:[#allocation2 + $0x90] sm:$0xff]  ;;  %v1296_v34 = vld [vmem:[#allocation2 + $0x8] sm:$0xff] }
 0x11d   : > { %3292 = vmatprep.mubr.msk.bf16.mxu0 %vm710_vm2, %v892_v49  ;;  %v1297_v35 = vld [vmem:[#allocation2 + $0x10] sm:$0xff]  ;;  %v1153_v36 = vpack.c.bf16 %v1145_v31, %v1144_v30  ;;  %v1568_v42 = vld [vmem:[#allocation2 + $0x98] sm:$0xff]  ;;  %v1569_v43 = vld [vmem:[#allocation2 + $0xa0] sm:$0xff] }
 0x11e   : > { %v1312_v38 = vpack.c.bf16 %v1297_v35, %v1296_v34  ;;  %v1722_v44 = vld [vmem:[#allocation2 + $0x19] sm:$0xff]  ;;  %v1723_v45 = vld [vmem:[#allocation2 + $0x21] sm:$0xff]  ;;  %v1720_v46 = vld [vmem:[#allocation2 + $0x9] sm:$0xff]  ;;  %v1577_v48 = vpack.c.bf16 %v1569_v43, %v1568_v42 }
 0x11f   : > { %v1721_v47 = vld [vmem:[#allocation2 + $0x11] sm:$0xff]  ;;  %v1724_v51 = vld [vmem:[#allocation2 + $0x29] sm:$0xff]  ;;  %v1726_v53 = vld [vmem:[#allocation2 + $0x39] sm:$0xff] }
 0x120   : > { %v1725_v52 = vld [vmem:[#allocation2 + $0x31] sm:$0xff]  ;;  %v1727_v54 = vld [vmem:[#allocation2 + $0x41] sm:$0xff]  ;;  %v1728_v58 = vld [vmem:[#allocation2 + $0x49] sm:$0xff] }
 0x121   : > { %v1738_v55 = vpack.c.bf16 %v1725_v52, %v1724_v51  ;;  %v1729_v59 = vld [vmem:[#allocation2 + $0x51] sm:$0xff]  ;;  %v1730_v60 = vld [vmem:[#allocation2 + $0x59] sm:$0xff]  ;;  %v1731_v61 = vld [vmem:[#allocation2 + $0x61] sm:$0xff] }
 0x122   : > { %v1732_v0 = vld [vmem:[#allocation2 + $0x69] sm:$0xff]  ;;  %v1733_v1 = vld [vmem:[#allocation2 + $0x71] sm:$0xff]  ;;  %v1734_v6 = vld [vmem:[#allocation2 + $0x79] sm:$0xff] }
 0x123   : > { %3275 = vmatmul.mubr.msk.bf16.gmra.mxu1 %vm710_vm2, %v894_v56  ;;  %v1735_v10 = vld [vmem:[#allocation2 + $0x81] sm:$0xff] }
 0x124   : > { %3293 = vmatmul.mubr.msk.bf16.gmra.mxu0 %vm710_vm2, %v893_v50  ;;  %3278 = vmatprep.mubr.msk.bf16.mxu1 %vm710_vm2, %v895_v57  ;;  %v1993_v19 = vld [vmem:[#allocation2 + $0xa1] sm:$0xff] }
 0x125   : > { %3296 = vmatprep.mubr.msk.bf16.mxu0 %vm710_vm2, %v894_v56  ;;  %v2560_v21 = vld [vmem:[%s4263_s7] sm:$0x3] }
 0x126   : > { %v2593_v22 = vsel %vm926_vm3, %v2560_v21, 0 }
 0x12b   : > { %3279 = vmatmul.mubr.msk.bf16.gmra.mxu1 %vm710_vm2, %v899_v62 }
 0x12c   : > { %3297 = vmatmul.mubr.msk.bf16.gmra.mxu0 %vm710_vm2, %v895_v57  ;;  %3302 = vmatprep.mubr.msk.bf16.mxu1 %vm710_vm2, %v890_v37  ;;  %v1324_v37 = vpack.c.bf16 %v1323_v33, %v1322_v32 }
 0x12d   : > { %3320 = vmatprep.mubr.msk.bf16.mxu0 %vm710_vm2, %v1313_v63 }
 0x133   : > { %3303 = vmatmul.mubr.msk.bf16.vlgmr.msra.gmra.mxu1 %vm710_vm2, %v891_v41  ;;  %v3072_v41 = vld [vmem:[%s4261_s5 + $0x10] sm:$0x3] }
 0x134   : > { %3321 = vmatmul.mubr.msk.bf16.vlgmr.msra.gmra.mxu0 %vm710_vm2, %v1314_v12  ;;  %3337 = vmatpush3.bf16.msra.mxu1 %v1455_v14  ;;  %v1743_v14 = vpack.c.bf16 %v1735_v10, %v1734_v6 }
 0x135   : > { %3306 = vmatprep.mubr.msk.bf16.mxu1 %vm710_vm2, %v892_v49  ;;  %3324 = vmatprep.mubr.msk.bf16.mxu0 %vm710_vm2, %v1315_v15  ;;  %v1737_v49 = vpack.c.bf16 %v1723_v45, %v1722_v44 }
 0x136   : > { %3355 = vmatpush3.bf16.msra.mxu0 %v1605_v16  ;;  %3452 = vmatprep.subr.msk.bf16.mxu1 %vm926_vm3, %v3055_v17  ;;  %v1747_v16 = vld [vmem:[#allocation2 + $0x91] sm:$0xff] }
 0x137   : > { %3453 = vmatprep.subr.msk.bf16.mxu0 %vm926_vm3, %v3054_v18  ;;  %v1992_v18 = vld [vmem:[#allocation2 + $0x99] sm:$0xff] }
 0x138   : > { %v2001_v20 = vpack.c.bf16 %v1993_v19, %v1992_v18 }
 0x13b   : > { %3307 = vmatmul.mubr.msk.bf16.gmra.mxu1 %vm710_vm2, %v893_v50  ;;  %v1736_v50 = vpack.c.bf16 %v1721_v47, %v1720_v46 }
 0x13c   : > { %3325 = vmatmul.mubr.msk.bf16.gmra.mxu0 %vm710_vm2, %v1316_v23  ;;  %3310 = vmatprep.mubr.msk.bf16.mxu1 %vm710_vm2, %v894_v56  ;;  %v1739_v56 = vpack.c.bf16 %v1727_v54, %v1726_v53 }
 0x13d   : > { %3328 = vmatprep.mubr.msk.bf16.mxu0 %vm710_vm2, %v1317_v13 }
 0x143   : > { %3311 = vmatmul.mubr.msk.bf16.gmra.mxu1 %vm710_vm2, %v895_v57  ;;  %v2029_v57 = vsel %vm926_vm3, %v3072_v41, 0 }
 0x144   : > { %3329 = vmatmul.mubr.msk.bf16.gmra.mxu0 %vm710_vm2, %v1318_v28  ;;  %3314 = vmatprep.mubr.msk.bf16.mxu1 %vm710_vm2, %v899_v62  ;;  %v1740_v62 = vpack.c.bf16 %v1729_v59, %v1728_v58 }
 0x145   : > { %3332 = vmatprep.mubr.msk.bf16.mxu0 %vm710_vm2, %v1319_v29 }
 0x14b   : > { %3315 = vmatmul.mubr.msk.bf16.gmra.mxu1 %vm710_vm2, %v1153_v36 }
 0x14c   : > { %3333 = vmatmul.mubr.msk.bf16.gmra.mxu0 %vm710_vm2, %v1324_v37  ;;  %3338 = vmatprep.mubr.msk.bf16.mxu1 %vm710_vm2, %v1312_v38 }
 0x14d   : > { %3356 = vmatprep.mubr.msk.bf16.mxu0 %vm710_vm2, %v1314_v12 }
 0x153   : > { %3339 = vmatmul.mubr.msk.bf16.vlgmr.msra.gmra.mxu1 %vm710_vm2, %v1313_v63  ;;  %v1741_v63 = vpack.c.bf16 %v1731_v61, %v1730_v60 }
 0x154   : > { %3357 = vmatmul.mubr.msk.bf16.vlgmr.msra.gmra.mxu0 %vm710_vm2, %v1315_v15  ;;  %3373 = vmatpush3.bf16.msra.mxu1 %v1776_v39 }
 0x155   : > { %3342 = vmatprep.mubr.msk.bf16.mxu1 %vm710_vm2, %v1314_v12  ;;  %3360 = vmatprep.mubr.msk.bf16.mxu0 %vm710_vm2, %v1316_v23  ;;  %v1742_v12 = vpack.c.bf16 %v1733_v1, %v1732_v0 }
 0x156   : > { %3391 = vmatpush3.bf16.msra.mxu0 %v1879_v40  ;;  %3454 = vmatprep.subr.msk.bf16.mxu1 %vm926_vm3, %v3072_v41 }
 0x157   : > { %3455 = vmatprep.subr.msk.bf16.mxu0 %vm926_vm3, %v2560_v21 }
 0x15b   : > { %3343 = vmatmul.mubr.msk.bf16.gmra.mxu1 %vm710_vm2, %v1315_v15  ;;  %v1746_v15 = vld [vmem:[#allocation2 + $0x89] sm:$0xff] }
 0x15c   : > { %3361 = vmatmul.mubr.msk.bf16.gmra.mxu0 %vm710_vm2, %v1317_v13  ;;  %3346 = vmatprep.mubr.msk.bf16.mxu1 %vm710_vm2, %v1316_v23  ;;  %v1748_v17 = vpack.c.bf16 %v1747_v16, %v1746_v15 }
 0x15d   : > { %3364 = vmatprep.mubr.msk.bf16.mxu0 %vm710_vm2, %v1318_v28 }
 0x163   : > { %3347 = vmatmul.mubr.msk.bf16.gmra.mxu1 %vm710_vm2, %v1317_v13 }
 0x164   : > { %3365 = vmatmul.mubr.msk.bf16.gmra.mxu0 %vm710_vm2, %v1319_v29  ;;  %3350 = vmatprep.mubr.msk.bf16.mxu1 %vm710_vm2, %v1318_v28 }
 0x165   : > { %3368 = vmatprep.mubr.msk.bf16.mxu0 %vm710_vm2, %v1324_v37 }
 0x16b   : > { %3351 = vmatmul.mubr.msk.bf16.gmra.mxu1 %vm710_vm2, %v1319_v29 }
 0x16c   : > { %3369 = vmatmul.mubr.msk.bf16.gmra.mxu0 %vm710_vm2, %v1577_v48  ;;  %3374 = vmatprep.mubr.msk.bf16.mxu1 %vm710_vm2, %v1737_v49 }
 0x16d   : > { %3392 = vmatprep.mubr.msk.bf16.mxu0 %vm710_vm2, %v1736_v50 }
 0x173   : > { %3375 = vmatmul.mubr.msk.bf16.vlgmr.msra.gmra.mxu1 %vm710_vm2, %v1738_v55 }
 0x174   : > { %3393 = vmatmul.mubr.msk.bf16.vlgmr.msra.gmra.mxu0 %vm710_vm2, %v1737_v49  ;;  %3409 = vmatpush3.bf16.msra.mxu1 %v2029_v57 }
 0x175   : > { %3378 = vmatprep.mubr.msk.bf16.mxu1 %vm710_vm2, %v1739_v56  ;;  %3396 = vmatprep.mubr.msk.bf16.mxu0 %vm710_vm2, %v1738_v55 }
 0x176   : > { %3427 = vmatpush3.bf16.msra.mxu0 %v2593_v22 }
 0x17b   : > { %3379 = vmatmul.mubr.msk.bf16.gmra.mxu1 %vm710_vm2, %v1740_v62 }
 0x17c   : > { %3397 = vmatmul.mubr.msk.bf16.gmra.mxu0 %vm710_vm2, %v1739_v56  ;;  %3382 = vmatprep.mubr.msk.bf16.mxu1 %vm710_vm2, %v1741_v63 }
 0x17d   : > { %3400 = vmatprep.mubr.msk.bf16.mxu0 %vm710_vm2, %v1740_v62 }
 0x183   : > { %3383 = vmatmul.mubr.msk.bf16.gmra.mxu1 %vm710_vm2, %v1742_v12 }
 0x184   : > { %3401 = vmatmul.mubr.msk.bf16.gmra.mxu0 %vm710_vm2, %v1741_v63  ;;  %3386 = vmatprep.mubr.msk.bf16.mxu1 %vm710_vm2, %v1743_v14 }
 0x185   : > { %3404 = vmatprep.mubr.msk.bf16.mxu0 %vm710_vm2, %v1742_v12 }
 0x18b   : > { %3387 = vmatmul.mubr.msk.bf16.gmra.mxu1 %vm710_vm2, %v1748_v17 }
 0x18c   : > { %3405 = vmatmul.mubr.msk.bf16.gmra.mxu0 %vm710_vm2, %v1743_v14  ;;  %3410 = vmatprep.mubr.msk.bf16.mxu1 %vm710_vm2, %v1738_v55 }
 0x193   : > { %3411 = vmatmul.mubr.msk.bf16.vlgmr.msra.gmra.mxu1 %vm710_vm2, %v1739_v56 }
 0x194   : > { %3414 = vmatprep.mubr.msk.bf16.mxu1 %vm710_vm2, %v1740_v62 }
 0x19b   : > { %3415 = vmatmul.mubr.msk.bf16.gmra.mxu1 %vm710_vm2, %v1741_v63 }
 0x19c   : > { %3418 = vmatprep.mubr.msk.bf16.mxu1 %vm710_vm2, %v1742_v12 }
 0x1a3   : > { %3419 = vmatmul.mubr.msk.bf16.gmra.mxu1 %vm710_vm2, %v1743_v14 }
 0x1a4   : > { %3422 = vmatprep.mubr.msk.bf16.mxu1 %vm710_vm2, %v1748_v17 }
 0x1ab   : > { %3423 = vmatmul.mubr.msk.bf16.gmra.mxu1 %vm710_vm2, %v2001_v20 }
 0x1d3   : > { %v3268_v23 = vpop.f32.mrf.mxu1 }
 0x1d4   : > { %v3286_v13 = vpop.f32.mrf.mxu0 }
 0x1d5   : > { %v1076_v24 = vadd.f32 %v3286_v13, %v3268_v23  ;;  %v964_v25 = vpop.f32.mrf.mxu1 }
 0x1d6   : > { %v1067_v26 = vpop.f32.mrf.mxu0 }
 0x1d7   : > { %v1068_v27 = vadd.f32 %v1067_v26, %v964_v25  ;;  %v3269_v28 = vpop.f32.mrf.mxu1 }
 0x1d8   : > { %v3287_v29 = vpop.f32.mrf.mxu0 }
 0x1d9   : > { %v1079_v30 = vadd.f32 %v3287_v29, %v3269_v28  ;;  %v967_v31 = vpop.f32.mrf.mxu1 }
 0x1da   : > { %v1070_v32 = vpop.f32.mrf.mxu0 }
 0x1db   : > { %v1071_v33 = vadd.f32 %v1070_v32, %v967_v31  ;;  %v3272_v34 = vpop.f32.mrf.mxu1 }
 0x1dc   : > { %v3290_v35 = vpop.f32.mrf.mxu0 }
 0x1dd   : > { %v1092_v36 = vadd.f32 %v3290_v35, %v3272_v34  ;;  %v980_v37 = vpop.f32.mrf.mxu1 }
 0x1de   : > { %v1083_v38 = vpop.f32.mrf.mxu0 }
 0x1df   : > { %v1084_v39 = vadd.f32 %v1083_v38, %v980_v37  ;;  %v3273_v40 = vpop.f32.mrf.mxu1 }
 0x1e0   : > { %v3291_v41 = vpop.f32.mrf.mxu0 }
 0x1e1   : > { %v1095_v42 = vadd.f32 %v3291_v41, %v3273_v40  ;;  %v983_v43 = vpop.f32.mrf.mxu1 }
 0x1e2   : > { %v1086_v44 = vpop.f32.mrf.mxu0 }
 0x1e3   : > { %v1087_v45 = vadd.f32 %v1086_v44, %v983_v43  ;;  %v3276_v46 = vpop.f32.mrf.mxu1 }
 0x1e4   : > { %v3294_v47 = vpop.f32.mrf.mxu0 }
 0x1e5   : > { %v1108_v48 = vadd.f32 %v3294_v47, %v3276_v46  ;;  %v996_v49 = vpop.f32.mrf.mxu1 }
 0x1e6   : > { %v1099_v50 = vpop.f32.mrf.mxu0 }
 0x1e7   : > { %v1100_v51 = vadd.f32 %v1099_v50, %v996_v49  ;;  %v3277_v52 = vpop.f32.mrf.mxu1 }
 0x1e8   : > { %v3295_v53 = vpop.f32.mrf.mxu0 }
 0x1e9   : > { %v1111_v54 = vadd.f32 %v3295_v53, %v3277_v52  ;;  %v999_v55 = vpop.f32.mrf.mxu1 }
 0x1ea   : > { %v1102_v56 = vpop.f32.mrf.mxu0 }
 0x1eb   : > { %v1103_v57 = vadd.f32 %v1102_v56, %v999_v55  ;;  %v3280_v58 = vpop.f32.mrf.mxu1 }
 0x1ec   : > { %v3298_v59 = vpop.f32.mrf.mxu0 }
 0x1ed   : > { %v1124_v60 = vadd.f32 %v3298_v59, %v3280_v58  ;;  %v1012_v61 = vpop.f32.mrf.mxu1 }
 0x1ee   : > { %v1115_v62 = vpop.f32.mrf.mxu0 }
 0x1ef   : > { %v1116_v63 = vadd.f32 %v1115_v62, %v1012_v61  ;;  %v3281_v0 = vpop.f32.mrf.mxu1 }
 0x1f0   : > { %v3299_v1 = vpop.f32.mrf.mxu0 }
 0x1f1   : > { %v1127_v6 = vadd.f32 %v3299_v1, %v3281_v0  ;;  %v1015_v10 = vpop.f32.mrf.mxu1 }
 0x1f2   : > { %v1118_v12 = vpop.f32.mrf.mxu0 }
 0x1f3   : > { %v1119_v14 = vadd.f32 %v1118_v12, %v1015_v10  ;;  %v3304_v15 = vpop.f32.mrf.mxu1 }
 0x1f4   : > { %v3322_v16 = vpop.f32.mrf.mxu0  ;;  %v3894_v17 = vadd.f32 %v3304_v15, %v1076_v24 }
 0x1f5   : > { %v1217_v18 = vpop.f32.mrf.mxu1 }
 0x1f6   : > { %v1388_v19 = vpop.f32.mrf.mxu0  ;;  %v3896_v20 = vadd.f32 %v1217_v18, %v1068_v27 }
 0x1f7   : > { %v3305_v21 = vpop.f32.mrf.mxu1 }
 0x1f8   : > { %v3898_v22 = vpop.f32.mrf.mxu0  ;;  %v3900_v23 = vadd.f32 %v3305_v21, %v1079_v30 }
 0x1f9   : > { %v1220_v13 = vpop.f32.mrf.mxu1 }
 0x1fa   : > { %v3902_v25 = vpop.f32.mrf.mxu0  ;;  %v3904_v26 = vadd.f32 %v1220_v13, %v1071_v33 }
 0x1fb   : > { %v3308_v28 = vpop.f32.mrf.mxu1 }
 0x1fc   : > { %v3906_v29 = vpop.f32.mrf.mxu0  ;;  %v3908_v31 = vadd.f32 %v3308_v28, %v1092_v36  ;;  %v2144_v36 = vlaneseq }
 0x1fd   : > { %v1233_v24 = vpop.f32.mrf.mxu1 }
 0x1fe   : > { %v3910_v32 = vpop.f32.mrf.mxu0  ;;  %v3912_v27 = vadd.f32 %v1233_v24, %v1084_v39 }
 0x1ff   : > { %v3309_v34 = vpop.f32.mrf.mxu1 }
 0x200   : > { %v3914_v35 = vpop.f32.mrf.mxu0  ;;  %v3916_v30 = vadd.f32 %v3309_v34, %v1095_v42  ;;  %v3932_v42 = vshrl.u32 %v2144_v36, 7 }
 0x201   : > { %v1236_v37 = vpop.f32.mrf.mxu1 }
 0x202   : > { %v3918_v38 = vpop.f32.mrf.mxu0  ;;  %v3920_v33 = vadd.f32 %v1236_v37, %v1087_v45  ;;  %v2147_v56 = vadd.s32 16, %v3932_v42  ;;  %v2165_v12 = vand.u32 15, %v3932_v42  ;;  %v2151_v21 = vadd.s32 48, %v3932_v42 }
 0x203   : > { %v3312_v40 = vpop.f32.mrf.mxu1  ;;  %v2149_v24 = vadd.s32 32, %v3932_v42 }
 0x204   : > { %v3922_v41 = vpop.f32.mrf.mxu0  ;;  %v3924_v43 = vadd.f32 %v3312_v40, %v1108_v48  ;;  %v2179_v0 = vand.u32 15, %v2147_v56  ;;  %vm2353_vm5 = vcmp.gt.s32.totalorder %v2165_v12, 0 }
 0x205   : > { %v1249_v44 = vpop.f32.mrf.mxu1 }
 0x206   : > { %v3926_v46 = vpop.f32.mrf.mxu0  ;;  %v3928_v39 = vadd.f32 %v1249_v44, %v1100_v51  ;;  %vm2355_vm4 = vcmp.gt.s32.totalorder %v2179_v0, 0  ;;  %v2207_v44 = vand.u32 15, %v2151_v21 }
 0x207   : > { %v3313_v47 = vpop.f32.mrf.mxu1  ;;  %v2403_v37 = vsel %vm2355_vm4, %v3894_v17, 0.0 }
 0x208   : > { %v3930_v49 = vpop.f32.mrf.mxu0  ;;  %v3934_v50 = vadd.f32 %v3313_v47, %v1111_v54  ;;  %vm2359_vm6 = vcmp.gt.s32.totalorder %v2207_v44, 0 }
 0x209   : > { %v1252_v45 = vpop.f32.mrf.mxu1 }
 0x20a   : > { %v3936_v52 = vpop.f32.mrf.mxu0  ;;  %v3938_v53 = vadd.f32 %v1252_v45, %v1103_v57 }
 0x20b   : > { %v3316_v55 = vpop.f32.mrf.mxu1 }
 0x20c   : > { %v3940_v48 = vpop.f32.mrf.mxu0  ;;  %v3943_v58 = vadd.f32 %v3316_v55, %v1124_v60  ;;  %v2401_v55 = vsel %vm2353_vm5, %v3896_v20, 0.0 }
 0x20d   : > { %v1265_v51 = vpop.f32.mrf.mxu1 }
 0x20e   : > { %v3945_v59 = vpop.f32.mrf.mxu0  ;;  %v3947_v61 = vadd.f32 %v1265_v51, %v1116_v63  ;;  %v2193_v51 = vand.u32 15, %v2149_v24 }
 0x20f   : > { %v3317_v62 = vpop.f32.mrf.mxu1 }
 0x210   : > { %v3949_v54 = vpop.f32.mrf.mxu0  ;;  %v3951_v1 = vadd.f32 %v3317_v62, %v1127_v6  ;;  %vm2357_vm7 = vcmp.gt.s32.totalorder %v2193_v51, 0 }
 0x211   : > { %v1268_v57 = vpop.f32.mrf.mxu1 }
 0x212   : > { %v3953_v10 = vpop.f32.mrf.mxu0  ;;  %v3956_v15 = vadd.f32 %v1268_v57, %v1119_v14  ;;  %v2155_v57 = vadd.s32 80, %v3932_v42 }
 0x213   : > { %v3340_v60 = vpop.f32.mrf.mxu1 }
 0x214   : > { %4290 = vst [vmem:[#allocation11_spill] sm:$0xff] %v3956_v15  ;;  %v3358_v18 = vpop.f32.mrf.mxu0  ;;  %v1500_v63 = vadd.f32 %v3340_v60, %v3322_v16  ;;  %v2152_v15 = vadd.s32 56, %v3932_v42 }
 0x215   : > { %v1491_v13 = vpop.f32.mrf.mxu1 }
 0x216   : > { %v1641_v28 = vpop.f32.mrf.mxu0  ;;  %v1706_v6 = vadd.f32 %v3358_v18, %v1500_v63  ;;  %v1492_v34 = vadd.f32 %v1491_v13, %v1388_v19  ;;  %v2153_v18 = vadd.s32 64, %v3932_v42  ;;  %v2407_v13 = vsel %vm2359_vm6, %v3908_v31, 0.0 }
 0x217   : > { %v3341_v40 = vpop.f32.mrf.mxu1 }
 0x218   : > { %v3359_v36 = vpop.f32.mrf.mxu0  ;;  %v3961_v14 = vadd.f32 %v2403_v37, %v1706_v6  ;;  %v1704_v47 = vadd.f32 %v1641_v28, %v1492_v34  ;;  %v1503_v45 = vadd.f32 %v3341_v40, %v3898_v22  ;;  %v2235_v6 = vand.u32 15, %v2155_v57 }
 0x219   : > { %v3965_v16 = vpop.f32.mrf.mxu1  ;;  %v2221_v44 = vand.u32 15, %v2153_v18 }
 0x21a   : > { %v3967_v56 = vpop.f32.mrf.mxu0  ;;  %v3969_v62 = vadd.f32 %v2401_v55, %v1704_v47  ;;  %v1707_v19 = vadd.f32 %v3359_v36, %v1503_v45  ;;  %vm2363_vm8 = vcmp.gt.s32.totalorder %v2235_v6, 0  ;;  %v2159_v55 = vadd.s32 112, %v3932_v42 }
 0x21b   : > { %v3344_v0 = vpop.f32.mrf.mxu1  ;;  %vm2361_vm9 = vcmp.gt.s32.totalorder %v2221_v44, 0  ;;  %v1495_v5 = vadd.f32 %v3965_v16, %v3902_v25 }
 0x21c   : > { %v3362_v17 = vpop.f32.mrf.mxu0  ;;  %v3973_v12 = vadd.f32 %v1707_v19, %v3900_v23  ;;  %v1516_v22 = vadd.f32 %v3344_v0, %v3906_v29  ;;  %v2405_v29 = vsel %vm2357_vm7, %v3912_v27, 0.0  ;;  %v2157_v0 = vadd.s32 96, %v3932_v42 }
 0x21d   : > { %v1507_v60 = vpop.f32.mrf.mxu1  ;;  %v2263_v18 = vand.u32 15, %v2159_v55 }
 0x21e   : > { %v1657_v20 = vpop.f32.mrf.mxu0  ;;  %v1710_v21 = vadd.f32 %v3362_v17, %v1516_v22  ;;  %v1508_v63 = vadd.f32 %v1507_v60, %v3910_v32  ;;  %v2411_v22 = vsel %vm2363_vm8, %v3924_v43, 0.0 }
 0x21f   : > { %v3345_v28 = vpop.f32.mrf.mxu1  ;;  %vm2367_vm10 = vcmp.gt.s32.totalorder %v2263_v18, 0 }
 0x220   : > { %v3363_v24 = vpop.f32.mrf.mxu0  ;;  %v3979_v34 = vadd.f32 %v2407_v13, %v1710_v21  ;;  %v1708_v37 = vadd.f32 %v1657_v20, %v1508_v63  ;;  %v1519_v23 = vadd.f32 %v3345_v28, %v3914_v35 }
 0x221   : > { %v3983_v40 = vpop.f32.mrf.mxu1 }
 0x222   : > { %v3985_v36 = vpop.f32.mrf.mxu0  ;;  %v3987_v47 = vadd.f32 %v2405_v29, %v1708_v37  ;;  %v1711_v32 = vadd.f32 %v3363_v24, %v1519_v23  ;;  %v2249_v24 = vand.u32 15, %v2157_v0 }
 0x223   : > { %v3348_v45 = vpop.f32.mrf.mxu1 }
 0x224   : > { %v3366_v31 = vpop.f32.mrf.mxu0  ;;  %v3991_v51 = vadd.f32 %v1711_v32, %v3916_v30  ;;  %v1532_v35 = vadd.f32 %v3348_v45, %v3922_v41  ;;  %v2409_v41 = vsel %vm2361_vm9, %v3928_v39, 0.0  ;;  %vm2365_vm11 = vcmp.gt.s32.totalorder %v2249_v24, 0 }
 0x225   : > { %v1523_v19 = vpop.f32.mrf.mxu1  ;;  %v2415_v45 = vsel %vm2367_vm10, %v3943_v58, 0.0 }
 0x226   : > { %v1673_v27 = vpop.f32.mrf.mxu0  ;;  %v1714_v17 = vadd.f32 %v3366_v31, %v1532_v35  ;;  %v1524_v57 = vadd.f32 %v1523_v19, %v3926_v46 }
 0x227   : > { %v3349_v60 = vpop.f32.mrf.mxu1 }
 0x228   : > { %v3367_v20 = vpop.f32.mrf.mxu0  ;;  %v3997_v21 = vadd.f32 %v2411_v22, %v1714_v17  ;;  %v1712_v63 = vadd.f32 %v1673_v27, %v1524_v57  ;;  %v1535_v30 = vadd.f32 %v3349_v60, %v3930_v49 }
 0x229   : > { %v4001_v13 = vpop.f32.mrf.mxu1 }
 0x22a   : > { %v4003_v28 = vpop.f32.mrf.mxu0  ;;  %v4005_v6 = vadd.f32 %v2409_v41, %v1712_v63  ;;  %v1715_v46 = vadd.f32 %v3367_v20, %v1535_v30 }
 0x22b   : > { %v3352_v37 = vpop.f32.mrf.mxu1 }
 0x22c   : > { %v3370_v43 = vpop.f32.mrf.mxu0  ;;  %v4008_v23 = vadd.f32 %v1715_v46, %v3934_v50  ;;  %v1548_v29 = vadd.f32 %v3352_v37, %v3940_v48  ;;  %v2413_v50 = vsel %vm2365_vm11, %v3947_v61, 0.0 }
 0x22d   : > { %v1539_v44 = vpop.f32.mrf.mxu1 }
 0x22e   : > { %v1689_v49 = vpop.f32.mrf.mxu0  ;;  %v1718_v39 = vadd.f32 %v3370_v43, %v1548_v29  ;;  %v1540_v32 = vadd.f32 %v1539_v44, %v3945_v59 }
 0x22f   : > { %v3353_v31 = vpop.f32.mrf.mxu1 }
 0x230   : > { %v3371_v55 = vpop.f32.mrf.mxu0  ;;  %v4013_v35 = vadd.f32 %v2415_v45, %v1718_v39  ;;  %v1716_v19 = vadd.f32 %v1689_v49, %v1540_v32  ;;  %v1551_v27 = vadd.f32 %v3353_v31, %v3949_v54 }
 0x231   : > { %v4017_v0 = vpop.f32.mrf.mxu1 }
 0x232   : > { %4291 = vst [vmem:[#allocation12_spill] sm:$0xff] %v4013_v35  ;;  %v4019_v48 = vpop.f32.mrf.mxu0  ;;  %v4021_v17 = vadd.f32 %v2413_v50, %v1716_v19  ;;  %v1719_v57 = vadd.f32 %v3371_v55, %v1551_v27  ;;  %v2148_v19 = vadd.s32 24, %v3932_v42 }
 0x233   : > { %v3376_v22 = vpop.f32.mrf.mxu1 }
 0x234   : > { %4292 = vst [vmem:[#allocation13_spill] sm:$0xff] %v4021_v17  ;;  %v3394_v59 = vpop.f32.mrf.mxu0  ;;  %v4024_v58 = vadd.f32 %v1719_v57, %v3951_v1  ;;  %v2146_v57 = vadd.s32 8, %v3932_v42  ;;  %v2186_v11 = vand.u32 15, %v2148_v19  ;;  %v2150_v17 = vadd.s32 40, %v3932_v42 }
 0x235   : > { %v1812_v60 = vpop.f32.mrf.mxu1  ;;  %v1924_v3 = vadd.f32 %v3394_v59, %v3376_v22 }
 0x236   : > { %4293 = vst [vmem:[#allocation14_spill] sm:$0xff] %v4024_v58  ;;  %v1915_v20 = vpop.f32.mrf.mxu0  ;;  %v2172_v58 = vand.u32 15, %v2146_v57  ;;  %vm4058_vm12 = vcmp.lt.s32.totalorder %v2186_v11, 15  ;;  %v2200_v11 = vand.u32 15, %v2150_v17 }
 0x237   : > { %v3377_v18 = vpop.f32.mrf.mxu1  ;;  %v1916_v7 = vadd.f32 %v1915_v20, %v1812_v60 }
 0x238   : > { %v3395_v63 = vpop.f32.mrf.mxu0  ;;  %vm4070_vm13 = vcmp.lt.s32.totalorder %v2172_v58, 15  ;;  %vm4093_vm15 = vcmp.lt.s32.totalorder %v2200_v11, 15 }
 0x239   : > { %v1815_v30 = vpop.f32.mrf.mxu1  ;;  %v1927_v35 = vadd.f32 %v3395_v63, %v3377_v18 }
 0x23a   : > { %v1918_v41 = vpop.f32.mrf.mxu0 }
 0x23b   : > { %v3380_v54 = vpop.f32.mrf.mxu1 }
 0x23c   : > { %v3398_v46 = vpop.f32.mrf.mxu0 }
 0x23d   : > { %v1828_v61 = vpop.f32.mrf.mxu1 }
 0x23e   : > { %v1931_v29 = vpop.f32.mrf.mxu0 }
 0x23f   : > { %v4026_v24 = vpop.f32.mrf.mxu1 }
 0x240   : > { %v3399_v49 = vpop.f32.mrf.mxu0 }
 0x241   : > { %v4028_v37 = vpop.f32.mrf.mxu1 }
 0x242   : > { %v1934_v45 = vpop.f32.mrf.mxu0 }
 0x243   : > { %v4030_v43 = vpop.f32.mrf.mxu1 }
 0x244   : > { %v4045_v27 = vpop.f32.mrf.mxu0 }
 0x245   : > { %v4032_v44 = vpop.f32.mrf.mxu1 }
 0x246   : > { %v4052_v2 = vpop.f32.mrf.mxu0 }
 0x247   : > { %v4034_v1 = vpop.f32.mrf.mxu1 }
 0x248   : > { %v4067_v60 = vpop.f32.mrf.mxu0 }
 0x249   : > { %v4036_v39 = vpop.f32.mrf.mxu1 }
 0x24b   : > { %v4038_v32 = vpop.f32.mrf.mxu1 }
 0x24d   : > { %v4040_v31 = vpop.f32.mrf.mxu1 }
 0x24f   : > { %v4042_v55 = vpop.f32.mrf.mxu1 }
 0x250   : > { %4294 = vst [vmem:[#allocation15_spill] sm:$0xff] %v4042_v55  ;;  %v1705_v55 = vadd.f32 %v3967_v56, %v1495_v5  ;;  %v1940_v56 = vadd.f32 %v3398_v46, %v3380_v54 }
 0x251   : > { %v4047_v50 = vpop.f32.mrf.mxu1 }
 0x252   : > { %4295 = vst [vmem:[#allocation16_spill] sm:$0xff] %v4047_v50 }
 0x253   : > { %v3412_v9 = vpop.f32.mrf.mxu1 }
 0x254   : > { %v2130_v8 = vadd.f32 %v3412_v9, %v1924_v3  ;;  %v1919_v3 = vadd.f32 %v1918_v41, %v1815_v30  ;;  %v4065_v9 = vld [vmem:[%s4262_s6] ss:$0 sm:$0xff]  ;;  %v2156_v30 = vadd.s32 88, %v3932_v42  ;;  %v1932_v41 = vadd.f32 %v1931_v29, %v1828_v61 }
 0x255   : > { %v2065_v4 = vpop.f32.mrf.mxu1  ;;  %v1943_v61 = vadd.f32 %v3399_v49, %v4026_v24 }
 0x256   : > { %v2128_v50 = vadd.f32 %v2065_v4, %v1916_v7  ;;  %v2499_v22 = vadd.f32 %v3961_v14, %v2130_v8  ;;  %v2214_v8 = vand.u32 15, %v2152_v15  ;;  %v1511_v14 = vadd.f32 %v3983_v40, %v3918_v38  ;;  %v1950_v40 = vpop.f32.mrf.mxu0 }
 0x257   : > { %v3413_v59 = vpop.f32.mrf.mxu1  ;;  %v2154_v38 = vadd.s32 72, %v3932_v42  ;;  %v1951_v19 = vadd.f32 %v1950_v40, %v4036_v39 }
 0x258   : > { %v2131_v16 = vadd.f32 %v3413_v59, %v1927_v35  ;;  %v2497_v4 = vadd.f32 %v3969_v62, %v2128_v50  ;;  %v2418_v35 = vadd.f32 %v1705_v55, %v3904_v26  ;;  %v2522_v63 = vadd.f32 %v4065_v9, %v2499_v22 }
 0x259   : > { %v2068_v7 = vpop.f32.mrf.mxu1  ;;  %vm4087_vm14 = vcmp.lt.s32.totalorder %v2214_v8, 15  ;;  %v2228_v5 = vand.u32 15, %v2154_v38 }
 0x25a   : > { %v2484_v20 = vsel %vm4058_vm12, %v2131_v16, 0.0  ;;  %v2129_v18 = vadd.f32 %v2068_v7, %v1919_v3  ;;  %v2520_v54 = vadd.f32 %v4065_v9, %v2497_v4  ;;  %v2538_v57 = vmax.f32 %v2522_v63, 0.0 }
 0x25b   : > { %v2500_v62 = vadd.f32 %v2484_v20, %v3973_v12  ;;  %v3416_v58 = vpop.f32.mrf.mxu1  ;;  %v1709_v12 = vadd.f32 %v3985_v36, %v1511_v14  ;;  %v1935_v16 = vadd.f32 %v1934_v45, %v4028_v37  ;;  %v2242_v7 = vand.u32 15, %v2156_v30  ;;  %v3406_v36 = vpop.f32.mrf.mxu0 }
 0x25c   : > { %v2482_v15 = vsel %vm4070_vm13, %v2129_v18, 0.0  ;;  %v2134_v17 = vadd.f32 %v3416_v58, %v1940_v56  ;;  %v2536_v8 = vmax.f32 %v2520_v54, 0.0  ;;  %v1527_v56 = vadd.f32 %v4001_v13, %v3936_v52 }
 0x25d   : > { %v2523_v46 = vadd.f32 %v4065_v9, %v2500_v62  ;;  %v2498_v26 = vadd.f32 %v2482_v15, %v2418_v35  ;;  %v2081_v55 = vpop.f32.mrf.mxu1  ;;  %v1956_v20 = vadd.f32 %v4045_v27, %v4030_v43  ;;  %v2422_v45 = vadd.f32 %v1709_v12, %v3920_v33  ;;  %v1963_v27 = vpop.f32.mrf.mxu0 }
 0x25e   : > { %v2132_v29 = vadd.f32 %v2081_v55, %v1932_v41  ;;  %v2503_v25 = vadd.f32 %v3979_v34, %v2134_v17  ;;  %v1948_v62 = vadd.f32 %v4052_v2, %v4032_v44  ;;  %v2160_v43 = vadd.s32 120, %v3932_v42 }
 0x25f   : > { %v2539_v22 = vmax.f32 %v2523_v46, 0.0  ;;  %v2521_v59 = vadd.f32 %v4065_v9, %v2498_v26  ;;  %v3417_v3 = vpop.f32.mrf.mxu1  ;;  %vm4118_vm0 = vcmp.lt.s32.totalorder %v2242_v7, 15  ;;  %v1713_v2 = vadd.f32 %v4003_v28, %v1527_v56 }
 0x260   : > { %v2135_v4 = vadd.f32 %v3417_v3, %v1943_v61  ;;  %v2501_v49 = vadd.f32 %v3987_v47, %v2132_v29  ;;  %v2526_v18 = vadd.f32 %v4065_v9, %v2503_v25  ;;  %v1959_v44 = vadd.f32 %v4067_v60, %v4034_v1  ;;  %v3407_v60 = vpop.f32.mrf.mxu0 }
 0x261   : > { %v2553_v24 = vpack.c.bf16 %v2539_v22, %v2538_v57  ;;  %v2084_v11 = vpop.f32.mrf.mxu1  ;;  %v2537_v14 = vmax.f32 %v2521_v59, 0.0  ;;  %vm4126_vm1 = vcmp.lt.s32.totalorder %v2228_v5, 15  ;;  %v2270_v12 = vand.u32 15, %v2160_v43 }
 0x262   : > { %v2488_v34 = vsel %vm4087_vm14, %v2135_v4, 0.0  ;;  %v2133_v37 = vadd.f32 %v2084_v11, %v1935_v16  ;;  %v2524_v58 = vadd.f32 %v4065_v9, %v2501_v49  ;;  %v2542_v38 = vmax.f32 %v2526_v18, 0.0  ;;  %v4312_v18 = vld [vmem:[#allocation16_spill] sm:$0xff] }
 0x263   : > { %v2504_v35 = vadd.f32 %v2488_v34, %v3991_v51  ;;  %v3420_v63 = vpop.f32.mrf.mxu1  ;;  %v2552_v47 = vpack.c.bf16 %v2537_v14, %v2536_v8  ;;  %v2158_v1 = vadd.s32 104, %v3932_v42  ;;  %v1543_v59 = vadd.f32 %v4017_v0, %v3953_v10  ;;  %v4315_v51 = vld [vmem:[#allocation14_spill] sm:$0xff] }
 0x264   : > { %v2486_v52 = vsel %vm4093_vm15, %v2133_v37, 0.0  ;;  %v2138_v13 = vadd.f32 %v3420_v63, %v1956_v20  ;;  %v2540_v61 = vmax.f32 %v2524_v58, 0.0  ;;  %v2426_v40 = vadd.f32 %v1713_v2, %v3938_v53  ;;  %v4311_v20 = vld [vmem:[#allocation12_spill] sm:$0xff] }
 0x265   : > { %v2527_v33 = vadd.f32 %v4065_v9, %v2504_v35  ;;  %v2502_v30 = vadd.f32 %v2486_v52, %v2422_v45  ;;  %v2097_v41 = vpop.f32.mrf.mxu1  ;;  %3428 = vmatprep.mubr.msk.bf16.mxu0 %vm710_vm2, %v2552_v47  ;;  %v1964_v4 = vadd.f32 %v1963_v27, %v4040_v31  ;;  %v2256_v0 = vand.u32 15, %v2158_v1  ;;  %v4313_v47 = vld [vmem:[#allocation13_spill] sm:$0xff] }
 0x266   : > { %v2136_v15 = vadd.f32 %v2097_v41, %v1948_v62  ;;  %3429 = vmatmul.mubr.msk.bf16.vlgmr.msra.gmra.mxu0 %vm710_vm2, %v2553_v24  ;;  %v2507_v46 = vadd.f32 %v3997_v21, %v2138_v13  ;;  %v1972_v21 = vadd.f32 %v3406_v36, %v4038_v32  ;;  %v1966_v32 = vpop.f32.mrf.mxu0  ;;  %v4308_v24 = vld [vmem:[#allocation15_spill] sm:$0xff]  ;;  %vm4152_vm3 = vcmp.lt.s32.totalorder %v2270_v12, 15 }
 0x267   : > { %v2525_v54 = vadd.f32 %v4065_v9, %v2502_v30  ;;  %v3421_v26 = vpop.f32.mrf.mxu1  ;;  %v2543_v55 = vmax.f32 %v2527_v33, 0.0  ;;  %v1975_v49 = vadd.f32 %v3407_v60, %v4308_v24  ;;  %v1967_v35 = vadd.f32 %v1966_v32, %v4312_v18  ;;  %v4314_v33 = vld [vmem:[#allocation11_spill] sm:$0xff]  ;;  %v4175_v60 = vld [vmem:[%s4264_s8] ss:$0 sm:$0xff] }
 0x268   : > { %v2139_v28 = vadd.f32 %v3421_v26, %v1959_v44  ;;  %v2505_v29 = vadd.f32 %v4005_v6, %v2136_v15  ;;  %v2530_v42 = vadd.f32 %v4065_v9, %v2507_v46  ;;  %vm2446_vm4 = vcmp.lt.s32.totalorder %v2256_v0, 15 }
 0x269   : > { %v2100_v50 = vpop.f32.mrf.mxu1  ;;  %v2541_v57 = vmax.f32 %v2525_v54, 0.0  ;;  %v2555_v22 = vpack.c.bf16 %v2543_v55, %v2542_v38 }
 0x26a   : > { %v2492_v25 = vsel %vm4118_vm0, %v2139_v28, 0.0  ;;  %v2137_v39 = vadd.f32 %v2100_v50, %v1951_v19  ;;  %v2528_v5 = vadd.f32 %v4065_v9, %v2505_v29  ;;  %v2546_v14 = vmax.f32 %v2530_v42, 0.0 }
 0x26b   : > { %v2508_v3 = vadd.f32 %v2492_v25, %v4008_v23  ;;  %v3424_v16 = vpop.f32.mrf.mxu1  ;;  %v2554_v6 = vpack.c.bf16 %v2541_v57, %v2540_v61  ;;  %v1717_v23 = vadd.f32 %v4019_v48, %v1543_v59  ;;  %v4316_v61 = vld [vmem:[#allocation5_spill] sm:$0xff] }
 0x26c   : > { %v2490_v7 = vsel %vm4126_vm1, %v2137_v39, 0.0  ;;  %v2142_v10 = vadd.f32 %v3424_v16, %v1972_v21  ;;  %v2544_v48 = vmax.f32 %v2528_v5, 0.0  ;;  %v2694_v29 = vunpack.c.l.bf16 %v4316_v61 }
 0x26d   : > { %v2531_v36 = vadd.f32 %v4065_v9, %v2508_v3  ;;  %v2506_v8 = vadd.f32 %v2490_v7, %v2426_v40  ;;  %v2113_v53 = vpop.f32.mrf.mxu1  ;;  %3432 = vmatprep.mubr.msk.bf16.mxu0 %vm710_vm2, %v2554_v6  ;;  %v2430_v30 = vadd.f32 %v1717_v23, %v4314_v33  ;;  %v2695_v39 = vunpack.c.h.bf16 %v4316_v61  ;;  %v4318_v7 = vld [vmem:[#allocation8_spill] sm:$0xff] }
 0x26e   : > { %v2140_v11 = vadd.f32 %v2113_v53, %v1964_v4  ;;  %3433 = vmatmul.mubr.msk.bf16.gmra.mxu0 %vm710_vm2, %v2555_v22  ;;  %v2511_v34 = vadd.f32 %v4311_v20, %v2142_v10  ;;  %v2698_v10 = vunpack.c.l.bf16 %v4318_v7  ;;  %v4319_v53 = vld [vmem:[#allocation7_spill] sm:$0xff] }
 0x26f   : > { %v2529_v56 = vadd.f32 %v4065_v9, %v2506_v8  ;;  %v3425_v37 = vpop.f32.mrf.mxu1  ;;  %v2547_v45 = vmax.f32 %v2531_v36, 0.0  ;;  %v2696_v23 = vunpack.c.l.bf16 %v4319_v53 }
 0x270   : > { %v2143_v63 = vadd.f32 %v3425_v37, %v1975_v49  ;;  %v2509_v62 = vadd.f32 %v4313_v47, %v2140_v11  ;;  %v2534_v41 = vadd.f32 %v4065_v9, %v2511_v34 }
 0x271   : > { %v2116_v52 = vpop.f32.mrf.mxu1  ;;  %v2545_v13 = vmax.f32 %v2529_v56, 0.0  ;;  %v2557_v43 = vpack.c.bf16 %v2547_v45, %v2546_v14  ;;  %v2699_v56 = vunpack.c.h.bf16 %v4318_v7 }
 0x272   : > { %v2496_v27 = vsel %vm4152_vm3, %v2143_v63, 0.0  ;;  %v2141_v58 = vadd.f32 %v2116_v52, %v1967_v35  ;;  %v2532_v17 = vadd.f32 %v4065_v9, %v2509_v62  ;;  %v2550_v46 = vmax.f32 %v2534_v41, 0.0 }
 0x273   : > { %v2512_v2 = vadd.f32 %v2496_v27, %v4315_v51  ;;  %v2556_v44 = vpack.c.bf16 %v2545_v13, %v2544_v48  ;;  %v2697_v35 = vunpack.c.h.bf16 %v4319_v53  ;;  %v4320_v13 = vld [vmem:[#allocation10_spill] sm:$0xff]  ;;  %v4321_v51 = vld [vmem:[#allocation9_spill] sm:$0xff] }
 0x274   : > { %v2494_v15 = vsel %vm2446_vm4, %v2141_v58, 0.0  ;;  %v2548_v19 = vmax.f32 %v2532_v17, 0.0 }
 0x275   : > { %v2535_v38 = vadd.f32 %v4065_v9, %v2512_v2  ;;  %v2510_v54 = vadd.f32 %v2494_v15, %v2430_v30  ;;  %3436 = vmatprep.mubr.msk.bf16.mxu0 %vm710_vm2, %v2556_v44  ;;  %v2700_v2 = vunpack.c.l.bf16 %v4321_v51 }
 0x276   : > { %3437 = vmatmul.mubr.msk.bf16.gmra.mxu0 %vm710_vm2, %v2557_v43  ;;  %v2702_v43 = vunpack.c.l.bf16 %v4320_v13 }
 0x277   : > { %v2533_v26 = vadd.f32 %v4065_v9, %v2510_v54  ;;  %v2551_v55 = vmax.f32 %v2535_v38, 0.0  ;;  %v4317_v9 = vld [vmem:[#allocation3_spill] sm:$0xff] }
 0x278   : > { %v2692_v22 = vunpack.c.l.bf16 %v4317_v9  ;;  %v2693_v6 = vunpack.c.h.bf16 %v4317_v9 }
 0x279   : > { %v2549_v28 = vmax.f32 %v2533_v26, 0.0  ;;  %v2559_v12 = vpack.c.bf16 %v2551_v55, %v2550_v46  ;;  %v2703_v46 = vunpack.c.h.bf16 %v4320_v13 }
 0x27b   : > { %v2558_v1 = vpack.c.bf16 %v2549_v28, %v2548_v19 }
 0x27d   : > { %3440 = vmatprep.mubr.msk.bf16.mxu0 %vm710_vm2, %v2558_v1  ;;  %v2701_v1 = vunpack.c.h.bf16 %v4321_v51 }
 0x27e   : > { %3441 = vmatmul.mubr.msk.bf16.gmra.mxu0 %vm710_vm2, %v2559_v12  ;;  %vm2804_vm2 = vcmask 125952  }
 0x326   : > { %v3430_v50 = vpop.f32.mrf.mxu0 }
 0x327   : > { %v2638_v57 = vadd.f32 %v3430_v50, %v4175_v60 }
 0x328   : > { %v2629_v59 = vpop.f32.mrf.mxu0 }
 0x329   : > { %v2710_v21 = vadd.f32 %v2694_v29, %v2638_v57  ;;  %v2630_v25 = vadd.f32 %v4175_v60, %v2629_v59 }
 0x32a   : > { %v3431_v40 = vpop.f32.mrf.mxu0 }
 0x32b   : > { %v2726_v42 = vmax.f32 %v2710_v21, 0.0  ;;  %v2708_v3 = vadd.f32 %v2692_v22, %v2630_v25  ;;  %v2641_v16 = vadd.f32 %v3431_v40, %v4175_v60  ;;  %v4322_v22 = vld [vmem:[#allocation6_spill] sm:$0xff] }
 0x32c   : > { %v2632_v4 = vpop.f32.mrf.mxu0  ;;  %v2706_v59 = vunpack.c.l.bf16 %v4322_v22 }
 0x32d   : > { %v3117_v0 = vpack.c.bf16 %v2726_v42, %v2726_v42  ;;  %v2724_v32 = vmax.f32 %v2708_v3, 0.0  ;;  %v2711_v5 = vadd.f32 %v2695_v39, %v2641_v16  ;;  %v2633_v36 = vadd.f32 %v4175_v60, %v2632_v4  ;;  %v4323_v3 = vld [vmem:[#allocation4_spill] sm:$0xff] }
 0x32e   : > { %v3434_v8 = vpop.f32.mrf.mxu0  ;;  %v2704_v16 = vunpack.c.l.bf16 %v4323_v3 }
 0x32f   : > { %2807 = vst.msk [vmem:[%s3662_s10 + $0x8] sm:$0xf] %vm2804_vm2, %v3117_v0  ;;  %v3115_v24 = vpack.c.bf16 %v2724_v32, %v2724_v32  ;;  %v2727_v49 = vmax.f32 %v2711_v5, 0.0  ;;  %v2709_v11 = vadd.f32 %v2693_v6, %v2633_v36  ;;  %v2654_v31 = vadd.f32 %v3434_v8, %v4175_v60 }
 0x330   : > { %v2645_v14 = vpop.f32.mrf.mxu0  ;;  %v2707_v32 = vunpack.c.h.bf16 %v4322_v22 }
 0x331   : > { %2805 = vst.msk [vmem:[%s3662_s10] sm:$0xf] %vm2804_vm2, %v3115_v24  ;;  %v3118_v20 = vpack.c.bf16 %v2727_v49, %v2727_v49  ;;  %v2725_v34 = vmax.f32 %v2709_v11, 0.0  ;;  %v2714_v37 = vadd.f32 %v2698_v10, %v2654_v31  ;;  %v2646_v45 = vadd.f32 %v4175_v60, %v2645_v14 }
 0x332   : > { %v3435_v18 = vpop.f32.mrf.mxu0  ;;  %v2705_v24 = vunpack.c.h.bf16 %v4323_v3 }
 0x333   : > { %2808 = vst.msk [vmem:[%s3662_s10 + $0xc] sm:$0xf] %vm2804_vm2, %v3118_v20  ;;  %v3116_v63 = vpack.c.bf16 %v2725_v34, %v2725_v34  ;;  %v2730_v48 = vmax.f32 %v2714_v37, 0.0  ;;  %v2712_v47 = vadd.f32 %v2696_v23, %v2646_v45  ;;  %v2657_v62 = vadd.f32 %v3435_v18, %v4175_v60 }
 0x334   : > { %v2648_v52 = vpop.f32.mrf.mxu0 }
 0x335   : > { %2806 = vst.msk [vmem:[%s3662_s10 + $0x4] sm:$0xf] %vm2804_vm2, %v3116_v63  ;;  %v3121_v27 = vpack.c.bf16 %v2730_v48, %v2730_v48  ;;  %v2728_v58 = vmax.f32 %v2712_v47, 0.0  ;;  %v2715_v33 = vadd.f32 %v2699_v56, %v2657_v62  ;;  %v2649_v30 = vadd.f32 %v4175_v60, %v2648_v52 }
 0x336   : > { %v3438_v41 = vpop.f32.mrf.mxu0 }
 0x337   : > { %2811 = vst.msk [vmem:[%s3662_s10 + $0x18] sm:$0xf] %vm2804_vm2, %v3121_v27  ;;  %v3119_v44 = vpack.c.bf16 %v2728_v58, %v2728_v58  ;;  %v2731_v15 = vmax.f32 %v2715_v33, 0.0  ;;  %v2713_v17 = vadd.f32 %v2697_v35, %v2649_v30  ;;  %v2670_v38 = vadd.f32 %v3438_v41, %v4175_v60 }
 0x338   : > { %v2661_v54 = vpop.f32.mrf.mxu0 }
 0x339   : > { %2809 = vst.msk [vmem:[%s3662_s10 + $0x10] sm:$0xf] %vm2804_vm2, %v3119_v44  ;;  %v3122_v26 = vpack.c.bf16 %v2731_v15, %v2731_v15  ;;  %v2729_v55 = vmax.f32 %v2713_v17, 0.0  ;;  %v2718_v19 = vadd.f32 %v2702_v43, %v2670_v38  ;;  %v2662_v28 = vadd.f32 %v4175_v60, %v2661_v54 }
 0x33a   : > { %v3439_v12 = vpop.f32.mrf.mxu0 }
 0x33b   : > { %2812 = vst.msk [vmem:[%s3662_s10 + $0x1c] sm:$0xf] %vm2804_vm2, %v3122_v26  ;;  %v3120_v61 = vpack.c.bf16 %v2729_v55, %v2729_v55  ;;  %v2734_v29 = vmax.f32 %v2718_v19, 0.0  ;;  %v2716_v50 = vadd.f32 %v2700_v2, %v2662_v28  ;;  %v2673_v57 = vadd.f32 %v3439_v12, %v4175_v60 }
 0x33c   : > { %v2664_v9 = vpop.f32.mrf.mxu0 }
 0x33d   : > { %2810 = vst.msk [vmem:[%s3662_s10 + $0x14] sm:$0xf] %vm2804_vm2, %v3120_v61  ;;  %v3125_v21 = vpack.c.bf16 %v2734_v29, %v2734_v29  ;;  %v2732_v25 = vmax.f32 %v2716_v50, 0.0  ;;  %v2719_v39 = vadd.f32 %v2703_v46, %v2673_v57  ;;  %v2665_v40 = vadd.f32 %v4175_v60, %v2664_v9 }
 0x33e   : > { %v3442_v42 = vpop.f32.mrf.mxu0 }
 0x33f   : > { %2815 = vst.msk [vmem:[%s3662_s10 + $0x28] sm:$0xf] %vm2804_vm2, %v3125_v21  ;;  %v3123_v6 = vpack.c.bf16 %v2732_v25, %v2732_v25  ;;  %v2735_v4 = vmax.f32 %v2719_v39, 0.0  ;;  %v2717_v7 = vadd.f32 %v2701_v1, %v2665_v40  ;;  %v2686_v10 = vadd.f32 %v3442_v42, %v4175_v60 }
 0x340   : > { %v2677_v0 = vpop.f32.mrf.mxu0 }
 0x341   : > { %2813 = vst.msk [vmem:[%s3662_s10 + $0x20] sm:$0xf] %vm2804_vm2, %v3123_v6  ;;  %v3126_v5 = vpack.c.bf16 %v2735_v4, %v2735_v4  ;;  %v2733_v36 = vmax.f32 %v2717_v7, 0.0  ;;  %v2722_v8 = vadd.f32 %v2706_v59, %v2686_v10  ;;  %v2678_v53 = vadd.f32 %v4175_v60, %v2677_v0 }
 0x342   : > { %v3443_v23 = vpop.f32.mrf.mxu0 }
 0x343   : > { %2816 = vst.msk [vmem:[%s3662_s10 + $0x2c] sm:$0xf] %vm2804_vm2, %v3126_v5  ;;  %v3124_v49 = vpack.c.bf16 %v2733_v36, %v2733_v36  ;;  %v2738_v11 = vmax.f32 %v2722_v8, 0.0  ;;  %v2720_v31 = vadd.f32 %v2704_v16, %v2678_v53  ;;  %v2689_v14 = vadd.f32 %v3443_v23, %v4175_v60 }
 0x344   : > { %v2680_v56 = vpop.f32.mrf.mxu0 }
 0x345   : > { %2814 = vst.msk [vmem:[%s3662_s10 + $0x24] sm:$0xf] %vm2804_vm2, %v3124_v49  ;;  %v3129_v20 = vpack.c.bf16 %v2738_v11, %v2738_v11  ;;  %v2736_v34 = vmax.f32 %v2720_v31, 0.0  ;;  %v2723_v37 = vadd.f32 %v2707_v32, %v2689_v14  ;;  %v2681_v45 = vadd.f32 %v4175_v60, %v2680_v56 }
 0x347   : > { %2819 = vst.msk [vmem:[%s3662_s10 + $0x38] sm:$0xf] %vm2804_vm2, %v3129_v20  ;;  %v3127_v18 = vpack.c.bf16 %v2736_v34, %v2736_v34  ;;  %v2739_v35 = vmax.f32 %v2723_v37, 0.0  ;;  %v2721_v63 = vadd.f32 %v2705_v24, %v2681_v45 }
 0x349   : > { %2817 = vst.msk [vmem:[%s3662_s10 + $0x30] sm:$0xf] %vm2804_vm2, %v3127_v18  ;;  %v3130_v48 = vpack.c.bf16 %v2739_v35, %v2739_v35  ;;  %v2737_v47 = vmax.f32 %v2721_v63, 0.0 }
 0x34b   : > { %2820 = vst.msk [vmem:[%s3662_s10 + $0x3c] sm:$0xf] %vm2804_vm2, %v3130_v48  ;;  %v3128_v62 = vpack.c.bf16 %v2737_v47, %v2737_v47 }
 0x34d   : > { %2818 = vst.msk [vmem:[%s3662_s10 + $0x34] sm:$0xf] %vm2804_vm2, %v3128_v62 }
 0x34e PF: > { %s19_s13 = sadd.s32 1, %s3558_s13   ;;  %s4324_s30 = smov %s3550_s11 }
 0x34f   : > { %p16_p1 = scmp.ge.s32.totalorder %s19_s13, 6   ;;  %s4325_s10 = smov %s3554_s12 }
 0x350   : > { %s4326_s11 = smov %s4329_s14  ;;  %s4327_s12 = smov %s4333_s15 }
 0x351   :  { %18 = sbr.rel (!%p16_p1) target bundleno = 3 (0x3), region = 116 }

</bundles_post_ra>
